<compile_context>
chip_gen: v6e
topology: v6e:2x2x1
jax: 0.10.0
libtpu: 0.0.40
codegen_flags: <defaults>
</compile_context>

<pallas_src>
import math
import functools

import jax
import jax.numpy as jnp
from jax.experimental import pallas as pl
from jax.experimental.pallas import tpu as pltpu

LN_EPS = 1e-5  # PyTorch nn.LayerNorm default


# ---------------------------------------------------------------------------
# Attention cores (run inside the fused kernel)
# ---------------------------------------------------------------------------
def _attention_head_loop(q3, k3, v3, *, n_heads, compute_dtype):
    """Per-head attention with static lane slices (preferred when d_k < 128:
    avoids (rows, D) <-> (G, rows, d_k) relayout passes)."""
    Bt, Lq, D = q3.shape
    S = k3.shape[1]
    d_k = D // n_heads
    f32 = jnp.float32
    cd = compute_dtype
    exact = jnp.dtype(cd) == jnp.float32
    outs = []
    for h in range(n_heads):
        sl = slice(h * d_k, (h + 1) * d_k)
        qh = q3[:, :, sl].astype(cd)
        kh = k3[:, :, sl].astype(cd)
        vh = v3[:, :, sl].astype(cd)
        s = jnp.einsum("bqd,bkd->bqk", qh, kh, preferred_element_type=f32)
        m = jnp.max(s, axis=-1, keepdims=True)
        e = jnp.exp(s - m)                                  # f32 softmax stats
        den = jnp.sum(e, axis=-1, keepdims=True)
        o = jnp.einsum("bqk,bkd->bqd", e.astype(cd), vh, preferred_element_type=f32)
        outs.append(o * pl.reciprocal(den, approx=not exact))  # normalize after PV
    return jnp.concatenate(outs, axis=-1)                   # (Bt, Lq, D)


def _attention_heads_batched(q3, k3, v3, *, n_heads, compute_dtype):
    """Single dot_general batched over (Bt, H) on the (Bt, L, H, d_k) view.
    Used only when d_k is a multiple of 128 (lane-dense heads)."""
    Bt, Lq, D = q3.shape
    S = k3.shape[1]
    d_k = D // n_heads
    f32 = jnp.float32
    cd = compute_dtype
    exact = jnp.dtype(cd) == jnp.float32
    qh = q3.reshape(Bt, Lq, n_heads, d_k).astype(cd)
    kh = k3.reshape(Bt, S, n_heads, d_k).astype(cd)
    vh = v3.reshape(Bt, S, n_heads, d_k).astype(cd)
    s = jnp.einsum("bqhd,bkhd->bhqk", qh, kh, preferred_element_type=f32)
    m = jnp.max(s, axis=-1, keepdims=True)
    e = jnp.exp(s - m)
    den = jnp.sum(e, axis=-1, keepdims=True)                # (Bt, H, Lq, 1)
    o = jnp.einsum("bhqk,bkhd->bqhd", e.astype(cd), vh, preferred_element_type=f32)
    o = o * pl.reciprocal(jnp.transpose(den, (0, 2, 1, 3)), approx=not exact)
    return o.reshape(Bt, Lq, D)                             # (Bt, Lq, D)


# ---------------------------------------------------------------------------
# Fused kernel: QKV proj -> MHA -> out_proj -> LN1 -> FFN -> LN2
# ---------------------------------------------------------------------------
def _readout_block_kernel(res_ref, tok_ref,
                          wq_ref, wk_ref, wv_ref, wo_ref, bo_ref,
                          g1_ref, b1_ref,
                          w1_ref, bb1_ref, w2_ref, bb2_ref,
                          g2_ref, b2_ref,
                          out_ref,
                          *, n_heads, compute_dtype, head_batched, dff_block):
    f32 = jnp.float32
    cd = compute_dtype
    Bt, Lkv, D = res_ref.shape
    S = tok_ref.shape[1]

    res3 = res_ref[...]
    tok3 = tok_ref[...]
    # Flatten the batch tile into the matmul M dimension (MXU occupancy).
    res2 = res3.reshape(Bt * Lkv, D).astype(cd)
    tok2 = tok3.reshape(Bt * S, D).astype(cd)

    # 1/sqrt(d_k) is folded into Wq at the wrapper -> no per-step scale mul.
    q = jnp.dot(res2, wq_ref[...], preferred_element_type=f32)
    k = jnp.dot(tok2, wk_ref[...], preferred_element_type=f32)
    v = jnp.dot(tok2, wv_ref[...], preferred_element_type=f32)

    q3 = q.reshape(Bt, Lkv, D)
    k3 = k.reshape(Bt, S, D)
    v3 = v.reshape(Bt, S, D)

    if head_batched:
        attn = _attention_heads_batched(q3, k3, v3, n_heads=n_heads,
                                        compute_dtype=cd)
    else:
        attn = _attention_head_loop(q3, k3, v3, n_heads=n_heads,
                                    compute_dtype=cd)

    upd = (jnp.dot(attn.reshape(Bt * Lkv, D).astype(cd), wo_ref[...],
                   preferred_element_type=f32)
           + bo_ref[...].astype(f32))                       # (Bt*Lkv, D)
    upd3 = upd.reshape(Bt, Lkv, D)

    # fixed_kv_len != seq_len reconciliation (static shapes), fused in-kernel.
    tok3f = tok3.astype(f32)
    if S == Lkv:
        x3 = tok3f + upd3
    elif S < Lkv:
        x3 = tok3f + upd3[:, :S, :]
    else:
        # Rows >= Lkv receive no attention update; split the residual add
        # instead of materializing zeros + concatenating a copy of upd.
        x3 = jnp.concatenate([tok3f[:, :Lkv, :] + upd3, tok3f[:, Lkv:, :]],
                             axis=1)
    x = x3.reshape(Bt * S, D)

    def layer_norm(xv, gamma, beta):
        mu = jnp.mean(xv, axis=-1, keepdims=True)
        var = jnp.mean(jnp.square(xv - mu), axis=-1, keepdims=True)
        return (xv - mu) * jax.lax.rsqrt(var + LN_EPS) * gamma + beta

    xn = layer_norm(x, g1_ref[...].astype(f32), b1_ref[...].astype(f32))
    xn_cd = xn.astype(cd)

    # FFN, K-tiled over D_ff: the f32 hidden never exceeds (rows, dff_block).
    D_ff = w1_ref.shape[1]
    f = None
    for c0 in range(0, D_ff, dff_block):
        c1 = c0 + dff_block
        h = (jnp.dot(xn_cd, w1_ref[:, c0:c1], preferred_element_type=f32)
             + bb1_ref[:, c0:c1].astype(f32))
        h = jnp.maximum(h, 0.0)                             # ReLU (dropout = id)
        part = jnp.dot(h.astype(cd), w2_ref[c0:c1, :], preferred_element_type=f32)
        f = part if f is None else f + part
    f = f + bb2_ref[...].astype(f32)

    y = layer_norm(xn + f, g2_ref[...].astype(f32), b2_ref[...].astype(f32))
    out_ref[...] = y.reshape(Bt, S, D).astype(out_ref.dtype)


# ---------------------------------------------------------------------------
# Wrapper helpers
# ---------------------------------------------------------------------------
def _vmem_ceiling_bytes():
    """Generation-aware VMEM ceiling (85% of physical, >= 32 MiB)."""
    try:
        cap = int(pltpu.get_tpu_info().vmem_capacity_bytes)
    except Exception:                      # noqa: BLE001 - host probe only
        cap = 64 * 1024 * 1024             # conservative (v7x-sized) fallback
    return max(int(cap * 0.85), 32 * 1024 * 1024)


def _pick_dff_block(d_ff):
    if d_ff <= 2048:
        return d_ff
    for blk in (2048, 1024, 512, 256, 128):
        if d_ff % blk == 0:
            return blk
    return d_ff


def _vmem_bytes_estimate(Bt, Lkv, S, D, D_ff, io_size, out_size, cd_size, dff_blk):
    """Rough per-step VMEM estimate (weights single-buffered, IO double-buffered)."""
    weights = (4 * D * D + 2 * D * D_ff) * cd_size + (5 * D + D_ff) * 4
    io = 2 * Bt * (Lkv + S) * D * io_size + 2 * Bt * S * D * out_size
    rows_q, rows_s = Bt * Lkv, Bt * S
    inter = (rows_q + 2 * rows_s) * D * 4          # q, k, v (f32)
    inter += 2 * Bt * Lkv * S * 4                  # scores + exp (one head live)
    inter += rows_q * D * 4                        # attention output
    inter += 3 * rows_s * D * 4                    # x, xn, ffn sum
    inter += rows_s * dff_blk * 4                  # ffn hidden chunk
    return weights + io + int(1.5 * inter) + (2 << 20)


def _auto_batch_tile(B, Lkv, S, D, D_ff, io_size, out_size, cd_size, dff_blk,
                     ceiling):
    """Largest batch tile that (a) fits the VMEM budget, (b) keeps >= 4 grid
    steps when possible (pipelining + v7x dual-TC), (c) reaches Bt*S >= 512
    matmul rows when possible."""
    divisors = [d for d in range(1, B + 1) if B % d == 0]
    fits = [d for d in divisors
            if _vmem_bytes_estimate(d, Lkv, S, D, D_ff, io_size, out_size,
                                    cd_size, dff_blk) <= ceiling]
    if not fits:
        fits = divisors[:1]
    target_rows = 512
    for want_grid in (4, 2, 1):
        cands = [d for d in fits if B // d >= want_grid]
        if not cands:
            continue
        good = [d for d in cands if d * S >= target_rows]
        return min(good) if good else max(cands)
    return fits[0]


def _const_spec(shape):
    """Constant-index, single-buffered block (fetched once, never re-fetched)."""
    zeros = (0,) * len(shape)
    return pl.BlockSpec(shape, lambda i: zeros, pipeline_mode=pl.Buffered(1))


# ---------------------------------------------------------------------------
# Jitted forward
# ---------------------------------------------------------------------------
@functools.partial(jax.jit,
                   static_argnames=("n_heads", "compute_dtype", "out_dtype",
                                    "batch_block", "dff_block"))
def _readout_block_jit(residual_state, token_embeddings, params, *,
                       n_heads, compute_dtype, out_dtype, batch_block,
                       dff_block):
    cd = jnp.dtype(compute_dtype)
    od = jnp.dtype(out_dtype)
    f32 = jnp.float32

    B, Lkv, D = residual_state.shape
    _, S, _ = token_embeddings.shape
    D_ff = params["w_ff1"].shape[1]
    assert D % n_heads == 0
    d_k = D // n_heads

    # Static head-path selection (no runtime probing / try-except fallback).
    head_batched = (d_k % 128 == 0)

    dff_blk = dff_block if dff_block is not None else _pick_dff_block(D_ff)
    assert D_ff % dff_blk == 0, "dff_block must divide d_ff"

    io_size = cd.itemsize
    out_size = od.itemsize
    ceiling = _vmem_ceiling_bytes()

    if batch_block is None:
        Bt = _auto_batch_tile(B, Lkv, S, D, D_ff, io_size, out_size,
                              cd.itemsize, dff_blk, ceiling)
    else:
        Bt = batch_block
    assert B % Bt == 0, "batch_block must divide the batch size"

    vmem_limit = int(min(max(_vmem_bytes_estimate(Bt, Lkv, S, D, D_ff, io_size,
                                                  out_size, cd.itemsize,
                                                  dff_blk),
                             32 * 1024 * 1024),
                         ceiling))

    # Weight prep (once, at the jit boundary): fold 1/sqrt(d_k) into Wq and
    # cast matmul weights to the compute dtype; biases / LN params stay f32.
    scale = 1.0 / math.sqrt(d_k)
    wq = (params["wq"] * scale).astype(cd)
    wk = params["wk"].astype(cd)
    wv = params["wv"].astype(cd)
    wo = params["wo"].astype(cd)
    w1 = params["w_ff1"].astype(cd)
    w2 = params["w_ff2"].astype(cd)
    bo = params["bo"].astype(f32)
    bb1 = params["b_ff1"].astype(f32)
    bb2 = params["b_ff2"].astype(f32)
    g1, be1 = params["ln1_g"].astype(f32), params["ln1_b"].astype(f32)
    g2, be2 = params["ln2_g"].astype(f32), params["ln2_b"].astype(f32)

    # Activations move HBM<->VMEM in the compute dtype (halves DMA bytes for bf16).
    res_in = residual_state.astype(cd)
    tok_in = token_embeddings.astype(cd)

    kern = functools.partial(_readout_block_kernel, n_heads=n_heads,
                             compute_dtype=cd, head_batched=head_batched,
                             dff_block=dff_blk)

    batched3 = lambda i: (i, 0, 0)

    return pl.pallas_call(
        kern,
        out_shape=jax.ShapeDtypeStruct((B, S, D), od),
        grid=(B // Bt,),
        in_specs=[
            pl.BlockSpec((Bt, Lkv, D), batched3),   # residual_state
            pl.BlockSpec((Bt, S, D), batched3),     # token_embeddings
            _const_spec((D, D)),                    # Wq (scale folded in)
            _const_spec((D, D)),                    # Wk
            _const_spec((D, D)),                    # Wv
            _const_spec((D, D)),                    # Wo
            _const_spec((1, D)),                    # out_proj bias
            _const_spec((1, D)),                    # ln1 gamma
            _const_spec((1, D)),                    # ln1 beta
            _const_spec((D, D_ff)),                 # W_ff1
            _const_spec((1, D_ff)),                 # b_ff1
            _const_spec((D_ff, D)),                 # W_ff2
            _const_spec((1, D)),                    # b_ff2
            _const_spec((1, D)),                    # ln2 gamma
            _const_spec((1, D)),                    # ln2 beta
        ],
        out_specs=pl.BlockSpec((Bt, S, D), batched3),
        compiler_params=pltpu.CompilerParams(
            dimension_semantics=("parallel",),
            vmem_limit_bytes=vmem_limit),
    )(res_in, tok_in, wq, wk, wv, wo, bo, g1, be1, w1, bb1, w2, bb2, g2, be2)


def readout_block(residual_state, token_embeddings, params, n_heads, *,
                  compute_dtype=jnp.bfloat16, out_dtype=None,
                  batch_block=None, dff_block=None):
    """Fused ReadoutBlock forward (attention + norm1 + FFN + norm2)."""
    cd = jnp.dtype(compute_dtype)
    od = jnp.dtype(out_dtype) if out_dtype is not None else cd
    return _readout_block_jit(residual_state, token_embeddings, params,
                              n_heads=n_heads, compute_dtype=cd.name,
                              out_dtype=od.name, batch_block=batch_block,
                              dff_block=dff_block)


# ---------------------------------------------------------------------------
# Pure-JAX reference (for correctness check)
# ---------------------------------------------------------------------------
def reference_forward(residual_state, token_embeddings, params, n_heads):
    B, Lkv, D = residual_state.shape
    _, S, _ = token_embeddings.shape
    d_k = D // n_heads

    q = residual_state @ params["wq"]
    k = token_embeddings @ params["wk"]
    v = token_embeddings @ params["wv"]
    q = q.reshape(B, Lkv, n_heads, d_k).transpose(0, 2, 1, 3)
    k = k.reshape(B, S, n_heads, d_k).transpose(0, 2, 1, 3)
    v = v.reshape(B, S, n_heads, d_k).transpose(0, 2, 1, 3)
    scores = q @ jnp.swapaxes(k, -2, -1) / math.sqrt(d_k)
    attn = jax.nn.softmax(scores, axis=-1) @ v
    attn = attn.transpose(0, 2, 1, 3).reshape(B, Lkv, D)
    upd = attn @ params["wo"] + params["bo"][0]
    if Lkv != S:
        if S <= Lkv:
            upd = upd[:, :S, :]
        else:
            upd = jnp.concatenate(
                [upd, jnp.zeros((B, S - Lkv, D), upd.dtype)], axis=1)

    def ln(x, g, b):
        mu = jnp.mean(x, -1, keepdims=True)
        var = jnp.mean((x - mu) ** 2, -1, keepdims=True)
        return (x - mu) / jnp.sqrt(var + LN_EPS) * g[0] + b[0]

    xn = ln(token_embeddings + upd, params["ln1_g"], params["ln1_b"])
    f = (jnp.maximum(xn @ params["w_ff1"] + params["b_ff1"][0], 0.0)
         @ params["w_ff2"] + params["b_ff2"][0])
    return ln(xn + f, params["ln2_g"], params["ln2_b"])


# ---------------------------------------------------------------------------
if __name__ == "__main__":
    # Small, TPU-friendly shapes consistent with the module's forward
    # (d_model is lane-dense; B=4 gives a 4-step pipelined "parallel" grid).
    B, Lkv, S, D, H, D_ff = 4, 8, 8, 128, 4, 256

    key = jax.random.PRNGKey(0)
    ks = jax.random.split(key, 12)
    sc = 0.08
    params = {
        "wq": sc * jax.random.normal(ks[0], (D, D), jnp.float32),
        "wk": sc * jax.random.normal(ks[1], (D, D), jnp.float32),
        "wv": sc * jax.random.normal(ks[2], (D, D), jnp.float32),
        "wo": sc * jax.random.normal(ks[3], (D, D), jnp.float32),
        "bo": sc * jax.random.normal(ks[4], (1, D), jnp.float32),
        "ln1_g": jnp.ones((1, D), jnp.float32),
        "ln1_b": jnp.zeros((1, D), jnp.float32),
        "w_ff1": sc * jax.random.normal(ks[5], (D, D_ff), jnp.float32),
        "b_ff1": sc * jax.random.normal(ks[6], (1, D_ff), jnp.float32),
        "w_ff2": sc * jax.random.normal(ks[7], (D_ff, D), jnp.float32),
        "b_ff2": sc * jax.random.normal(ks[8], (1, D), jnp.float32),
        "ln2_g": jnp.ones((1, D), jnp.float32),
        "ln2_b": jnp.zeros((1, D), jnp.float32),
    }

    residual_state = jax.random.normal(ks[9], (B, Lkv, D), jnp.float32)
    token_embeddings = jax.random.normal(ks[10], (B, S, D), jnp.float32)

    ref = reference_forward(residual_state, token_embeddings, params, H)

    def rel_frob(a, b):
        a = a.astype(jnp.float32)
        return float(jnp.linalg.norm(a - b) / (jnp.linalg.norm(b) + 1e-12))

    # f32 path: structural / math check (exact reciprocal, f32 IO & output).
    out_f32 = readout_block(residual_state, token_embeddings, params, H,
                            compute_dtype=jnp.float32)
    out_f32 = jax.block_until_ready(out_f32)
    assert out_f32.shape == (B, S, D) and out_f32.dtype == jnp.float32
    assert jnp.allclose(out_f32, ref, atol=5e-2, rtol=5e-2), "f32 kernel mismatch"
    assert rel_frob(out_f32, ref) < 2e-2, "f32 kernel relative error too large"

    # bf16 path (recommended on v6e/v7x): bf16 MXU, bf16 activation DMA,
    # bf16 output -- intentional precision trade-off, looser tolerance.
    out_bf16 = readout_block(residual_state, token_embeddings, params, H,
                             compute_dtype=jnp.bfloat16)
    out_bf16 = jax.block_until_ready(out_bf16)
    assert out_bf16.shape == (B, S, D) and out_bf16.dtype == jnp.bfloat16
    assert jnp.allclose(out_bf16.astype(jnp.float32), ref,
                        atol=1e-1, rtol=1e-1), "bf16 kernel mismatch"
    assert rel_frob(out_bf16, ref) < 6e-2, "bf16 kernel relative error too large"

    print("KERNEL_OK")
</pallas_src>

<mosaic_0001>
module attributes {stable_mosaic.version = 11 : i64} {
  func.func @_readout_block_kernel(%arg0: i32, %arg1: memref<1x8x128xf32, #tpu.memory_space<vmem>>, %arg2: memref<1x8x128xf32, #tpu.memory_space<vmem>>, %arg3: memref<128x128xf32, #tpu.memory_space<vmem>>, %arg4: memref<128x128xf32, #tpu.memory_space<vmem>>, %arg5: memref<128x128xf32, #tpu.memory_space<vmem>>, %arg6: memref<128x128xf32, #tpu.memory_space<vmem>>, %arg7: memref<1x128xf32, #tpu.memory_space<vmem>>, %arg8: memref<1x128xf32, #tpu.memory_space<vmem>>, %arg9: memref<1x128xf32, #tpu.memory_space<vmem>>, %arg10: memref<128x256xf32, #tpu.memory_space<vmem>>, %arg11: memref<1x256xf32, #tpu.memory_space<vmem>>, %arg12: memref<256x128xf32, #tpu.memory_space<vmem>>, %arg13: memref<1x128xf32, #tpu.memory_space<vmem>>, %arg14: memref<1x128xf32, #tpu.memory_space<vmem>>, %arg15: memref<1x128xf32, #tpu.memory_space<vmem>>, %arg16: memref<1x8x128xf32, #tpu.memory_space<vmem>>) attributes {dimension_semantics = [#tpu.dimension_semantics<parallel>], iteration_bounds = array<i64: 4>, scalar_prefetch = 0 : i64, scratch_operands = 0 : i64, tpu.core_type = #tpu.core_type<tc>, window_params = [{transform_indices = @transform_0, window_bounds = array<i64: 1, 8, 128>}, {transform_indices = @transform_1, window_bounds = array<i64: 1, 8, 128>}, {pipeline_mode = #tpu.pipeline_mode<synchronous>, transform_indices = @transform_2, window_bounds = array<i64: 128, 128>}, {pipeline_mode = #tpu.pipeline_mode<synchronous>, transform_indices = @transform_3, window_bounds = array<i64: 128, 128>}, {pipeline_mode = #tpu.pipeline_mode<synchronous>, transform_indices = @transform_4, window_bounds = array<i64: 128, 128>}, {pipeline_mode = #tpu.pipeline_mode<synchronous>, transform_indices = @transform_5, window_bounds = array<i64: 128, 128>}, {pipeline_mode = #tpu.pipeline_mode<synchronous>, transform_indices = @transform_6, window_bounds = array<i64: 1, 128>}, {pipeline_mode = #tpu.pipeline_mode<synchronous>, transform_indices = @transform_7, window_bounds = array<i64: 1, 128>}, {pipeline_mode = #tpu.pipeline_mode<synchronous>, transform_indices = @transform_8, window_bounds = array<i64: 1, 128>}, {pipeline_mode = #tpu.pipeline_mode<synchronous>, transform_indices = @transform_9, window_bounds = array<i64: 128, 256>}, {pipeline_mode = #tpu.pipeline_mode<synchronous>, transform_indices = @transform_10, window_bounds = array<i64: 1, 256>}, {pipeline_mode = #tpu.pipeline_mode<synchronous>, transform_indices = @transform_11, window_bounds = array<i64: 256, 128>}, {pipeline_mode = #tpu.pipeline_mode<synchronous>, transform_indices = @transform_12, window_bounds = array<i64: 1, 128>}, {pipeline_mode = #tpu.pipeline_mode<synchronous>, transform_indices = @transform_13, window_bounds = array<i64: 1, 128>}, {pipeline_mode = #tpu.pipeline_mode<synchronous>, transform_indices = @transform_14, window_bounds = array<i64: 1, 128>}, {transform_indices = @transform_15, window_bounds = array<i64: 1, 8, 128>}]} {
    %c0 = arith.constant 0 : index
    %c0_0 = arith.constant 0 : index
    %c0_1 = arith.constant 0 : index
    %0 = vector.load %arg1[%c0, %c0_0, %c0_1] : memref<1x8x128xf32, #tpu.memory_space<vmem>>, vector<1x8x128xf32>
    %c0_2 = arith.constant 0 : index
    %c0_3 = arith.constant 0 : index
    %c0_4 = arith.constant 0 : index
    %1 = vector.load %arg2[%c0_2, %c0_3, %c0_4] : memref<1x8x128xf32, #tpu.memory_space<vmem>>, vector<1x8x128xf32>
    %2 = vector.shape_cast %0 : vector<1x8x128xf32> to vector<8x128xf32>
    %3 = vector.shape_cast %1 : vector<1x8x128xf32> to vector<8x128xf32>
    %c0_5 = arith.constant 0 : index
    %c0_6 = arith.constant 0 : index
    %4 = vector.load %arg3[%c0_5, %c0_6] : memref<128x128xf32, #tpu.memory_space<vmem>>, vector<128x128xf32>
    %cst = arith.constant dense<0.000000e+00> : vector<8x128xf32>
    %5 = tpu.matmul %2, %4, %cst {dimension_numbers = #tpu.dot_dimension_numbers<[1], [0], [0], [1], [0, 0, 1, 1], [], []>} : vector<8x128xf32>, vector<128x128xf32>, vector<8x128xf32> -> vector<8x128xf32>
    %c0_7 = arith.constant 0 : index
    %c0_8 = arith.constant 0 : index
    %6 = vector.load %arg4[%c0_7, %c0_8] : memref<128x128xf32, #tpu.memory_space<vmem>>, vector<128x128xf32>
    %cst_9 = arith.constant dense<0.000000e+00> : vector<8x128xf32>
    %7 = tpu.matmul %3, %6, %cst_9 {dimension_numbers = #tpu.dot_dimension_numbers<[1], [0], [0], [1], [0, 0, 1, 1], [], []>} : vector<8x128xf32>, vector<128x128xf32>, vector<8x128xf32> -> vector<8x128xf32>
    %c0_10 = arith.constant 0 : index
    %c0_11 = arith.constant 0 : index
    %8 = vector.load %arg5[%c0_10, %c0_11] : memref<128x128xf32, #tpu.memory_space<vmem>>, vector<128x128xf32>
    %cst_12 = arith.constant dense<0.000000e+00> : vector<8x128xf32>
    %9 = tpu.matmul %3, %8, %cst_12 {dimension_numbers = #tpu.dot_dimension_numbers<[1], [0], [0], [1], [0, 0, 1, 1], [], []>} : vector<8x128xf32>, vector<128x128xf32>, vector<8x128xf32> -> vector<8x128xf32>
    %10 = vector.shape_cast %5 : vector<8x128xf32> to vector<1x8x128xf32>
    %11 = vector.shape_cast %7 : vector<8x128xf32> to vector<1x8x128xf32>
    %12 = vector.shape_cast %9 : vector<8x128xf32> to vector<1x8x128xf32>
    %13 = vector.extract_strided_slice %10 {offsets = [0, 0, 0], sizes = [1, 8, 32], strides = [1, 1, 1]} : vector<1x8x128xf32> to vector<1x8x32xf32>
    %14 = vector.extract_strided_slice %11 {offsets = [0, 0, 0], sizes = [1, 8, 32], strides = [1, 1, 1]} : vector<1x8x128xf32> to vector<1x8x32xf32>
    %15 = vector.extract_strided_slice %12 {offsets = [0, 0, 0], sizes = [1, 8, 32], strides = [1, 1, 1]} : vector<1x8x128xf32> to vector<1x8x32xf32>
    "tpu.trace_start"() <{level = 10 : i32, message = "bqd,bkd->bqk"}> : () -> ()
    %cst_13 = arith.constant dense<0.000000e+00> : vector<1x8x8xf32>
    %16 = tpu.matmul %13, %14, %cst_13 {dimension_numbers = #tpu.dot_dimension_numbers<[2], [2], [1], [1], [0, 0, 0, 1, 1, 1], [0], [0]>} : vector<1x8x32xf32>, vector<1x8x32xf32>, vector<1x8x8xf32> -> vector<1x8x8xf32>
    "tpu.trace_stop"() : () -> ()
    %cst_14 = arith.constant dense<0xFF800000> : vector<1x8xf32>
    %17 = vector.multi_reduction <maximumf>, %16, %cst_14 [2] : vector<1x8x8xf32> to vector<1x8xf32>
    %18 = vector.shape_cast %17 : vector<1x8xf32> to vector<1x8x1xf32>
    %19 = vector.broadcast %18 : vector<1x8x1xf32> to vector<1x8x8xf32>
    %20 = arith.subf %16, %19 : vector<1x8x8xf32>
    %21 = math.exp %20 : vector<1x8x8xf32>
    %cst_15 = arith.constant dense<0.000000e+00> : vector<1x8xf32>
    %22 = vector.multi_reduction <add>, %21, %cst_15 [2] : vector<1x8x8xf32> to vector<1x8xf32>
    %23 = vector.shape_cast %22 : vector<1x8xf32> to vector<1x8x1xf32>
    "tpu.trace_start"() <{level = 10 : i32, message = "bqk,bkd->bqd"}> : () -> ()
    %cst_16 = arith.constant dense<0.000000e+00> : vector<1x8x32xf32>
    %24 = tpu.matmul %21, %15, %cst_16 {dimension_numbers = #tpu.dot_dimension_numbers<[2], [1], [1], [2], [0, 0, 0, 1, 1, 2], [0], [0]>} : vector<1x8x8xf32>, vector<1x8x32xf32>, vector<1x8x32xf32> -> vector<1x8x32xf32>
    "tpu.trace_stop"() : () -> ()
    %25 = tpu.reciprocal %23 : vector<1x8x1xf32> -> vector<1x8x1xf32>
    %26 = vector.broadcast %25 : vector<1x8x1xf32> to vector<1x8x32xf32>
    %27 = arith.mulf %24, %26 : vector<1x8x32xf32>
    %28 = vector.extract_strided_slice %10 {offsets = [0, 0, 32], sizes = [1, 8, 32], strides = [1, 1, 1]} : vector<1x8x128xf32> to vector<1x8x32xf32>
    %29 = vector.extract_strided_slice %11 {offsets = [0, 0, 32], sizes = [1, 8, 32], strides = [1, 1, 1]} : vector<1x8x128xf32> to vector<1x8x32xf32>
    %30 = vector.extract_strided_slice %12 {offsets = [0, 0, 32], sizes = [1, 8, 32], strides = [1, 1, 1]} : vector<1x8x128xf32> to vector<1x8x32xf32>
    "tpu.trace_start"() <{level = 10 : i32, message = "bqd,bkd->bqk"}> : () -> ()
    %cst_17 = arith.constant dense<0.000000e+00> : vector<1x8x8xf32>
    %31 = tpu.matmul %28, %29, %cst_17 {dimension_numbers = #tpu.dot_dimension_numbers<[2], [2], [1], [1], [0, 0, 0, 1, 1, 1], [0], [0]>} : vector<1x8x32xf32>, vector<1x8x32xf32>, vector<1x8x8xf32> -> vector<1x8x8xf32>
    "tpu.trace_stop"() : () -> ()
    %cst_18 = arith.constant dense<0xFF800000> : vector<1x8xf32>
    %32 = vector.multi_reduction <maximumf>, %31, %cst_18 [2] : vector<1x8x8xf32> to vector<1x8xf32>
    %33 = vector.shape_cast %32 : vector<1x8xf32> to vector<1x8x1xf32>
    %34 = vector.broadcast %33 : vector<1x8x1xf32> to vector<1x8x8xf32>
    %35 = arith.subf %31, %34 : vector<1x8x8xf32>
    %36 = math.exp %35 : vector<1x8x8xf32>
    %cst_19 = arith.constant dense<0.000000e+00> : vector<1x8xf32>
    %37 = vector.multi_reduction <add>, %36, %cst_19 [2] : vector<1x8x8xf32> to vector<1x8xf32>
    %38 = vector.shape_cast %37 : vector<1x8xf32> to vector<1x8x1xf32>
    "tpu.trace_start"() <{level = 10 : i32, message = "bqk,bkd->bqd"}> : () -> ()
    %cst_20 = arith.constant dense<0.000000e+00> : vector<1x8x32xf32>
    %39 = tpu.matmul %36, %30, %cst_20 {dimension_numbers = #tpu.dot_dimension_numbers<[2], [1], [1], [2], [0, 0, 0, 1, 1, 2], [0], [0]>} : vector<1x8x8xf32>, vector<1x8x32xf32>, vector<1x8x32xf32> -> vector<1x8x32xf32>
    "tpu.trace_stop"() : () -> ()
    %40 = tpu.reciprocal %38 : vector<1x8x1xf32> -> vector<1x8x1xf32>
    %41 = vector.broadcast %40 : vector<1x8x1xf32> to vector<1x8x32xf32>
    %42 = arith.mulf %39, %41 : vector<1x8x32xf32>
    %43 = vector.extract_strided_slice %10 {offsets = [0, 0, 64], sizes = [1, 8, 32], strides = [1, 1, 1]} : vector<1x8x128xf32> to vector<1x8x32xf32>
    %44 = vector.extract_strided_slice %11 {offsets = [0, 0, 64], sizes = [1, 8, 32], strides = [1, 1, 1]} : vector<1x8x128xf32> to vector<1x8x32xf32>
    %45 = vector.extract_strided_slice %12 {offsets = [0, 0, 64], sizes = [1, 8, 32], strides = [1, 1, 1]} : vector<1x8x128xf32> to vector<1x8x32xf32>
    "tpu.trace_start"() <{level = 10 : i32, message = "bqd,bkd->bqk"}> : () -> ()
    %cst_21 = arith.constant dense<0.000000e+00> : vector<1x8x8xf32>
    %46 = tpu.matmul %43, %44, %cst_21 {dimension_numbers = #tpu.dot_dimension_numbers<[2], [2], [1], [1], [0, 0, 0, 1, 1, 1], [0], [0]>} : vector<1x8x32xf32>, vector<1x8x32xf32>, vector<1x8x8xf32> -> vector<1x8x8xf32>
    "tpu.trace_stop"() : () -> ()
    %cst_22 = arith.constant dense<0xFF800000> : vector<1x8xf32>
    %47 = vector.multi_reduction <maximumf>, %46, %cst_22 [2] : vector<1x8x8xf32> to vector<1x8xf32>
    %48 = vector.shape_cast %47 : vector<1x8xf32> to vector<1x8x1xf32>
    %49 = vector.broadcast %48 : vector<1x8x1xf32> to vector<1x8x8xf32>
    %50 = arith.subf %46, %49 : vector<1x8x8xf32>
    %51 = math.exp %50 : vector<1x8x8xf32>
    %cst_23 = arith.constant dense<0.000000e+00> : vector<1x8xf32>
    %52 = vector.multi_reduction <add>, %51, %cst_23 [2] : vector<1x8x8xf32> to vector<1x8xf32>
    %53 = vector.shape_cast %52 : vector<1x8xf32> to vector<1x8x1xf32>
    "tpu.trace_start"() <{level = 10 : i32, message = "bqk,bkd->bqd"}> : () -> ()
    %cst_24 = arith.constant dense<0.000000e+00> : vector<1x8x32xf32>
    %54 = tpu.matmul %51, %45, %cst_24 {dimension_numbers = #tpu.dot_dimension_numbers<[2], [1], [1], [2], [0, 0, 0, 1, 1, 2], [0], [0]>} : vector<1x8x8xf32>, vector<1x8x32xf32>, vector<1x8x32xf32> -> vector<1x8x32xf32>
    "tpu.trace_stop"() : () -> ()
    %55 = tpu.reciprocal %53 : vector<1x8x1xf32> -> vector<1x8x1xf32>
    %56 = vector.broadcast %55 : vector<1x8x1xf32> to vector<1x8x32xf32>
    %57 = arith.mulf %54, %56 : vector<1x8x32xf32>
    %58 = vector.extract_strided_slice %10 {offsets = [0, 0, 96], sizes = [1, 8, 32], strides = [1, 1, 1]} : vector<1x8x128xf32> to vector<1x8x32xf32>
    %59 = vector.extract_strided_slice %11 {offsets = [0, 0, 96], sizes = [1, 8, 32], strides = [1, 1, 1]} : vector<1x8x128xf32> to vector<1x8x32xf32>
    %60 = vector.extract_strided_slice %12 {offsets = [0, 0, 96], sizes = [1, 8, 32], strides = [1, 1, 1]} : vector<1x8x128xf32> to vector<1x8x32xf32>
    "tpu.trace_start"() <{level = 10 : i32, message = "bqd,bkd->bqk"}> : () -> ()
    %cst_25 = arith.constant dense<0.000000e+00> : vector<1x8x8xf32>
    %61 = tpu.matmul %58, %59, %cst_25 {dimension_numbers = #tpu.dot_dimension_numbers<[2], [2], [1], [1], [0, 0, 0, 1, 1, 1], [0], [0]>} : vector<1x8x32xf32>, vector<1x8x32xf32>, vector<1x8x8xf32> -> vector<1x8x8xf32>
    "tpu.trace_stop"() : () -> ()
    %cst_26 = arith.constant dense<0xFF800000> : vector<1x8xf32>
    %62 = vector.multi_reduction <maximumf>, %61, %cst_26 [2] : vector<1x8x8xf32> to vector<1x8xf32>
    %63 = vector.shape_cast %62 : vector<1x8xf32> to vector<1x8x1xf32>
    %64 = vector.broadcast %63 : vector<1x8x1xf32> to vector<1x8x8xf32>
    %65 = arith.subf %61, %64 : vector<1x8x8xf32>
    %66 = math.exp %65 : vector<1x8x8xf32>
    %cst_27 = arith.constant dense<0.000000e+00> : vector<1x8xf32>
    %67 = vector.multi_reduction <add>, %66, %cst_27 [2] : vector<1x8x8xf32> to vector<1x8xf32>
    %68 = vector.shape_cast %67 : vector<1x8xf32> to vector<1x8x1xf32>
    "tpu.trace_start"() <{level = 10 : i32, message = "bqk,bkd->bqd"}> : () -> ()
    %cst_28 = arith.constant dense<0.000000e+00> : vector<1x8x32xf32>
    %69 = tpu.matmul %66, %60, %cst_28 {dimension_numbers = #tpu.dot_dimension_numbers<[2], [1], [1], [2], [0, 0, 0, 1, 1, 2], [0], [0]>} : vector<1x8x8xf32>, vector<1x8x32xf32>, vector<1x8x32xf32> -> vector<1x8x32xf32>
    "tpu.trace_stop"() : () -> ()
    %70 = tpu.reciprocal %68 : vector<1x8x1xf32> -> vector<1x8x1xf32>
    %71 = vector.broadcast %70 : vector<1x8x1xf32> to vector<1x8x32xf32>
    %72 = arith.mulf %69, %71 : vector<1x8x32xf32>
    %73 = tpu.concatenate %27, %42, %57, %72 in 2 : vector<1x8x32xf32>, vector<1x8x32xf32>, vector<1x8x32xf32>, vector<1x8x32xf32> -> vector<1x8x128xf32>
    %74 = vector.shape_cast %73 : vector<1x8x128xf32> to vector<8x128xf32>
    %c0_29 = arith.constant 0 : index
    %c0_30 = arith.constant 0 : index
    %75 = vector.load %arg6[%c0_29, %c0_30] : memref<128x128xf32, #tpu.memory_space<vmem>>, vector<128x128xf32>
    %cst_31 = arith.constant dense<0.000000e+00> : vector<8x128xf32>
    %76 = tpu.matmul %74, %75, %cst_31 {dimension_numbers = #tpu.dot_dimension_numbers<[1], [0], [0], [1], [0, 0, 1, 1], [], []>} : vector<8x128xf32>, vector<128x128xf32>, vector<8x128xf32> -> vector<8x128xf32>
    %c0_32 = arith.constant 0 : index
    %c0_33 = arith.constant 0 : index
    %77 = vector.load %arg7[%c0_32, %c0_33] : memref<1x128xf32, #tpu.memory_space<vmem>>, vector<1x128xf32>
    %78 = vector.broadcast %77 : vector<1x128xf32> to vector<8x128xf32>
    %79 = arith.addf %76, %78 : vector<8x128xf32>
    %80 = vector.shape_cast %79 : vector<8x128xf32> to vector<1x8x128xf32>
    %81 = arith.addf %1, %80 : vector<1x8x128xf32>
    %82 = vector.shape_cast %81 : vector<1x8x128xf32> to vector<8x128xf32>
    %c0_34 = arith.constant 0 : index
    %c0_35 = arith.constant 0 : index
    %83 = vector.load %arg8[%c0_34, %c0_35] : memref<1x128xf32, #tpu.memory_space<vmem>>, vector<1x128xf32>
    %c0_36 = arith.constant 0 : index
    %c0_37 = arith.constant 0 : index
    %84 = vector.load %arg9[%c0_36, %c0_37] : memref<1x128xf32, #tpu.memory_space<vmem>>, vector<1x128xf32>
    %cst_38 = arith.constant dense<0.000000e+00> : vector<8xf32>
    %85 = vector.multi_reduction <add>, %82, %cst_38 [1] : vector<8x128xf32> to vector<8xf32>
    %86 = vector.shape_cast %85 : vector<8xf32> to vector<8x1xf32>
    %cst_39 = arith.constant 1.280000e+02 : f32
    %87 = vector.broadcast %cst_39 : f32 to vector<8x1xf32>
    %88 = arith.divf %86, %87 : vector<8x1xf32>
    %89 = vector.broadcast %88 : vector<8x1xf32> to vector<8x128xf32>
    %90 = arith.subf %82, %89 : vector<8x128xf32>
    %91 = arith.mulf %90, %90 : vector<8x128xf32>
    %cst_40 = arith.constant dense<0.000000e+00> : vector<8xf32>
    %92 = vector.multi_reduction <add>, %91, %cst_40 [1] : vector<8x128xf32> to vector<8xf32>
    %93 = vector.shape_cast %92 : vector<8xf32> to vector<8x1xf32>
    %cst_41 = arith.constant 1.280000e+02 : f32
    %94 = vector.broadcast %cst_41 : f32 to vector<8x1xf32>
    %95 = arith.divf %93, %94 : vector<8x1xf32>
    %96 = vector.broadcast %88 : vector<8x1xf32> to vector<8x128xf32>
    %97 = arith.subf %82, %96 : vector<8x128xf32>
    %cst_42 = arith.constant 9.99999974E-6 : f32
    %98 = vector.broadcast %cst_42 : f32 to vector<8x1xf32>
    %99 = arith.addf %95, %98 : vector<8x1xf32>
    %100 = math.rsqrt %99 : vector<8x1xf32>
    %101 = vector.broadcast %100 : vector<8x1xf32> to vector<8x128xf32>
    %102 = arith.mulf %97, %101 : vector<8x128xf32>
    %103 = vector.broadcast %83 : vector<1x128xf32> to vector<8x128xf32>
    %104 = arith.mulf %102, %103 : vector<8x128xf32>
    %105 = vector.broadcast %84 : vector<1x128xf32> to vector<8x128xf32>
    %106 = arith.addf %104, %105 : vector<8x128xf32>
    %c0_43 = arith.constant 0 : index
    %c0_44 = arith.constant 0 : index
    %107 = vector.load %arg10[%c0_43, %c0_44] : memref<128x256xf32, #tpu.memory_space<vmem>>, vector<128x256xf32>
    %cst_45 = arith.constant dense<0.000000e+00> : vector<8x256xf32>
    %108 = tpu.matmul %106, %107, %cst_45 {dimension_numbers = #tpu.dot_dimension_numbers<[1], [0], [0], [1], [0, 0, 1, 1], [], []>} : vector<8x128xf32>, vector<128x256xf32>, vector<8x256xf32> -> vector<8x256xf32>
    %c0_46 = arith.constant 0 : index
    %c0_47 = arith.constant 0 : index
    %109 = vector.load %arg11[%c0_46, %c0_47] : memref<1x256xf32, #tpu.memory_space<vmem>>, vector<1x256xf32>
    %110 = vector.broadcast %109 : vector<1x256xf32> to vector<8x256xf32>
    %111 = arith.addf %108, %110 : vector<8x256xf32>
    %cst_48 = arith.constant 0.000000e+00 : f32
    %112 = vector.broadcast %cst_48 : f32 to vector<8x256xf32>
    %113 = arith.maximumf %111, %112 : vector<8x256xf32>
    %c0_49 = arith.constant 0 : index
    %c0_50 = arith.constant 0 : index
    %114 = vector.load %arg12[%c0_49, %c0_50] : memref<256x128xf32, #tpu.memory_space<vmem>>, vector<256x128xf32>
    %cst_51 = arith.constant dense<0.000000e+00> : vector<8x128xf32>
    %115 = tpu.matmul %113, %114, %cst_51 {dimension_numbers = #tpu.dot_dimension_numbers<[1], [0], [0], [1], [0, 0, 1, 1], [], []>} : vector<8x256xf32>, vector<256x128xf32>, vector<8x128xf32> -> vector<8x128xf32>
    %c0_52 = arith.constant 0 : index
    %c0_53 = arith.constant 0 : index
    %116 = vector.load %arg13[%c0_52, %c0_53] : memref<1x128xf32, #tpu.memory_space<vmem>>, vector<1x128xf32>
    %117 = vector.broadcast %116 : vector<1x128xf32> to vector<8x128xf32>
    %118 = arith.addf %115, %117 : vector<8x128xf32>
    %119 = arith.addf %106, %118 : vector<8x128xf32>
    %c0_54 = arith.constant 0 : index
    %c0_55 = arith.constant 0 : index
    %120 = vector.load %arg14[%c0_54, %c0_55] : memref<1x128xf32, #tpu.memory_space<vmem>>, vector<1x128xf32>
    %c0_56 = arith.constant 0 : index
    %c0_57 = arith.constant 0 : index
    %121 = vector.load %arg15[%c0_56, %c0_57] : memref<1x128xf32, #tpu.memory_space<vmem>>, vector<1x128xf32>
    %cst_58 = arith.constant dense<0.000000e+00> : vector<8xf32>
    %122 = vector.multi_reduction <add>, %119, %cst_58 [1] : vector<8x128xf32> to vector<8xf32>
    %123 = vector.shape_cast %122 : vector<8xf32> to vector<8x1xf32>
    %cst_59 = arith.constant 1.280000e+02 : f32
    %124 = vector.broadcast %cst_59 : f32 to vector<8x1xf32>
    %125 = arith.divf %123, %124 : vector<8x1xf32>
    %126 = vector.broadcast %125 : vector<8x1xf32> to vector<8x128xf32>
    %127 = arith.subf %119, %126 : vector<8x128xf32>
    %128 = arith.mulf %127, %127 : vector<8x128xf32>
    %cst_60 = arith.constant dense<0.000000e+00> : vector<8xf32>
    %129 = vector.multi_reduction <add>, %128, %cst_60 [1] : vector<8x128xf32> to vector<8xf32>
    %130 = vector.shape_cast %129 : vector<8xf32> to vector<8x1xf32>
    %cst_61 = arith.constant 1.280000e+02 : f32
    %131 = vector.broadcast %cst_61 : f32 to vector<8x1xf32>
    %132 = arith.divf %130, %131 : vector<8x1xf32>
    %133 = vector.broadcast %125 : vector<8x1xf32> to vector<8x128xf32>
    %134 = arith.subf %119, %133 : vector<8x128xf32>
    %cst_62 = arith.constant 9.99999974E-6 : f32
    %135 = vector.broadcast %cst_62 : f32 to vector<8x1xf32>
    %136 = arith.addf %132, %135 : vector<8x1xf32>
    %137 = math.rsqrt %136 : vector<8x1xf32>
    %138 = vector.broadcast %137 : vector<8x1xf32> to vector<8x128xf32>
    %139 = arith.mulf %134, %138 : vector<8x128xf32>
    %140 = vector.broadcast %120 : vector<1x128xf32> to vector<8x128xf32>
    %141 = arith.mulf %139, %140 : vector<8x128xf32>
    %142 = vector.broadcast %121 : vector<1x128xf32> to vector<8x128xf32>
    %143 = arith.addf %141, %142 : vector<8x128xf32>
    %144 = vector.shape_cast %143 : vector<8x128xf32> to vector<1x8x128xf32>
    %c0_63 = arith.constant 0 : index
    %c0_64 = arith.constant 0 : index
    %c0_65 = arith.constant 0 : index
    %145 = vector.load %arg16[%c0_63, %c0_64, %c0_65] : memref<1x8x128xf32, #tpu.memory_space<vmem>>, vector<1x8x128xf32>
    tpu.vector_store %arg16[%c0_63, %c0_64, %c0_65], %144 {strides = array<i32>} : memref<1x8x128xf32, #tpu.memory_space<vmem>>, vector<1x8x128xf32>,
    return
  }
  func.func @transform_0(%arg0: i32) -> (i32, i32, i32) {
    %c0_i32 = arith.constant 0 : i32
    %c0_i32_0 = arith.constant 0 : i32
    %c0_i32_1 = arith.constant 0 : i32
    return %arg0, %c0_i32, %c0_i32_0 : i32, i32, i32
  }
  func.func @transform_1(%arg0: i32) -> (i32, i32, i32) {
    %c0_i32 = arith.constant 0 : i32
    %c0_i32_0 = arith.constant 0 : i32
    %c0_i32_1 = arith.constant 0 : i32
    return %arg0, %c0_i32, %c0_i32_0 : i32, i32, i32
  }
  func.func @transform_2(%arg0: i32) -> (i32, i32) {
    %c0_i32 = arith.constant 0 : i32
    %c0_i32_0 = arith.constant 0 : i32
    %c0_i32_1 = arith.constant 0 : i32
    return %c0_i32, %c0_i32_0 : i32, i32
  }
  func.func @transform_3(%arg0: i32) -> (i32, i32) {
    %c0_i32 = arith.constant 0 : i32
    %c0_i32_0 = arith.constant 0 : i32
    %c0_i32_1 = arith.constant 0 : i32
    return %c0_i32, %c0_i32_0 : i32, i32
  }
  func.func @transform_4(%arg0: i32) -> (i32, i32) {
    %c0_i32 = arith.constant 0 : i32
    %c0_i32_0 = arith.constant 0 : i32
    %c0_i32_1 = arith.constant 0 : i32
    return %c0_i32, %c0_i32_0 : i32, i32
  }
  func.func @transform_5(%arg0: i32) -> (i32, i32) {
    %c0_i32 = arith.constant 0 : i32
    %c0_i32_0 = arith.constant 0 : i32
    %c0_i32_1 = arith.constant 0 : i32
    return %c0_i32, %c0_i32_0 : i32, i32
  }
  func.func @transform_6(%arg0: i32) -> (i32, i32) {
    %c0_i32 = arith.constant 0 : i32
    %c0_i32_0 = arith.constant 0 : i32
    %c0_i32_1 = arith.constant 0 : i32
    return %c0_i32, %c0_i32_0 : i32, i32
  }
  func.func @transform_7(%arg0: i32) -> (i32, i32) {
    %c0_i32 = arith.constant 0 : i32
    %c0_i32_0 = arith.constant 0 : i32
    %c0_i32_1 = arith.constant 0 : i32
    return %c0_i32, %c0_i32_0 : i32, i32
  }
  func.func @transform_8(%arg0: i32) -> (i32, i32) {
    %c0_i32 = arith.constant 0 : i32
    %c0_i32_0 = arith.constant 0 : i32
    %c0_i32_1 = arith.constant 0 : i32
    return %c0_i32, %c0_i32_0 : i32, i32
  }
  func.func @transform_9(%arg0: i32) -> (i32, i32) {
    %c0_i32 = arith.constant 0 : i32
    %c0_i32_0 = arith.constant 0 : i32
    %c0_i32_1 = arith.constant 0 : i32
    return %c0_i32, %c0_i32_0 : i32, i32
  }
  func.func @transform_10(%arg0: i32) -> (i32, i32) {
    %c0_i32 = arith.constant 0 : i32
    %c0_i32_0 = arith.constant 0 : i32
    %c0_i32_1 = arith.constant 0 : i32
    return %c0_i32, %c0_i32_0 : i32, i32
  }
  func.func @transform_11(%arg0: i32) -> (i32, i32) {
    %c0_i32 = arith.constant 0 : i32
    %c0_i32_0 = arith.constant 0 : i32
    %c0_i32_1 = arith.constant 0 : i32
    return %c0_i32, %c0_i32_0 : i32, i32
  }
  func.func @transform_12(%arg0: i32) -> (i32, i32) {
    %c0_i32 = arith.constant 0 : i32
    %c0_i32_0 = arith.constant 0 : i32
    %c0_i32_1 = arith.constant 0 : i32
    return %c0_i32, %c0_i32_0 : i32, i32
  }
  func.func @transform_13(%arg0: i32) -> (i32, i32) {
    %c0_i32 = arith.constant 0 : i32
    %c0_i32_0 = arith.constant 0 : i32
    %c0_i32_1 = arith.constant 0 : i32
    return %c0_i32, %c0_i32_0 : i32, i32
  }
  func.func @transform_14(%arg0: i32) -> (i32, i32) {
    %c0_i32 = arith.constant 0 : i32
    %c0_i32_0 = arith.constant 0 : i32
    %c0_i32_1 = arith.constant 0 : i32
    return %c0_i32, %c0_i32_0 : i32, i32
  }
  func.func @transform_15(%arg0: i32) -> (i32, i32, i32) {
    %c0_i32 = arith.constant 0 : i32
    %c0_i32_0 = arith.constant 0 : i32
    %c0_i32_1 = arith.constant 0 : i32
    return %arg0, %c0_i32, %c0_i32_0 : i32, i32, i32
  }
}

</mosaic_0001>

<bundles_post_ra>
// kernel: _readout_block_jit.1
= control target key start
LH: loop header
LB: loop body
LE: loop exit
PB: predicated region body
PF: predicated region fallthrough
CT: control target
= control target key end

     0   :  { %s3442_s0 = inlined_call_operand.hbm [shape: f32[4,8,128], index: 0, kind: input, shape index: {}]   ;;  %s3443_s1 = inlined_call_operand.hbm [shape: f32[4,8,128], index: 1, kind: input, shape index: {}]   ;;  %s3444_s2 = inlined_call_operand.vmem [shape: f32[128,128], index: 2, kind: input, shape index: {}]   ;;  %s3445_s3 = inlined_call_operand.hbm [shape: f32[128,128], index: 3, kind: input, shape index: {}]   ;;  %s3446_s4 = inlined_call_operand.hbm [shape: f32[128,128], index: 4, kind: input, shape index: {}]   ;;  %s3447_s5 = inlined_call_operand.hbm [shape: f32[128,128], index: 5, kind: input, shape index: {}]   ;;  %s3448_s6 = inlined_call_operand.vmem [shape: f32[1,128], index: 6, kind: input, shape index: {}]   ;;  %s3449_s7 = inlined_call_operand.vmem [shape: f32[1,128], index: 7, kind: input, shape index: {}]   ;;  %s3450_s8 = inlined_call_operand.vmem [shape: f32[1,128], index: 8, kind: input, shape index: {}]   ;;  %s3451_s9 = inlined_call_operand.vmem [shape: f32[128,256], index: 9, kind: input, shape index: {}]   ;;  %s3452_s10 = inlined_call_operand.vmem [shape: f32[1,256], index: 10, kind: input, shape index: {}]   ;;  %s3453_s11 = inlined_call_operand.hbm [shape: f32[256,128], index: 11, kind: input, shape index: {}]   ;;  %s3454_s12 = inlined_call_operand.vmem [shape: f32[1,128], index: 12, kind: input, shape index: {}]   ;;  %s3455_s13 = inlined_call_operand.vmem [shape: f32[1,128], index: 13, kind: input, shape index: {}]   ;;  %s3456_s14 = inlined_call_operand.vmem [shape: f32[1,128], index: 14, kind: input, shape index: {}]   ;;  %s3457_s15 = inlined_call_operand.hbm [shape: f32[4,8,128], index: 15, kind: output, shape index: {}]  }
   0x1   :  { %3468 = sst [smem:[#allocation25_spill]] %s3445_s3 }
   0x2   :  { %3469 = sst [smem:[#allocation26_spill]] %s3446_s4 }
   0x3   :  { %3470 = sst [smem:[#allocation27_spill]] %s3447_s5 }
   0x4   :  { %3471 = sst [smem:[#allocation28_spill]] %s3453_s11 }
   0x5   :  { %3472 = sst [smem:[#allocation29_spill]] %s3455_s13 }
   0x6   :  { %3473 = sst [smem:[#allocation30_spill]] %s3456_s14 }
   0x7   :  { %3474 = sst [smem:[#allocation31_spill]] %s3457_s15 }
   0x8   :  { %20 = vsyncpa [#allocation3], 0 }
   0x9   :  { %22 = vsyncpa [#allocation3 + $0x1], 0 }
   0xa   :  { %23 = vsyncpa [#allocation6], 0 }
   0xb   :  { %25 = vsyncpa [#allocation6 + $0x1], 0 }
   0xc   :  { %26 = vsyncpa [#allocation9], 0 }
   0xd   :  { %27 = vsyncpa [#allocation12], 0 }
   0xe   :  { %28 = vsyncpa [#allocation4], 0 }
   0xf   :  { %30 = vsyncpa [#allocation4 + $0x1], 0  ;;  %s2857_s18 = smov 0   ;;  %s2859_s19 = smov 0  }
  0x10   :  { %s2861_s20 = smov 0   ;;  %s2863_s21 = smov 0  }
  0x11 LB: > { %3475 = sst [smem:[#allocation20_spill]] %s2749_s18  ;;  %s2763_s22 = smov [#allocation7]   ;;  %s2761_s21 = sphi %s2863_s21, %s3506_s21   ;;  %s2757_s20 = sphi %s2861_s20, %s3508_s20   ;;  %s2753_s19 = sphi %s2859_s19, %s3510_s19   ;;  %s2749_s18 = sphi %s2857_s18, %s3509_s18  }
  0x12   : > { %3476 = sst [smem:[#allocation21_spill]] %s2757_s20  ;;  %s407_s23 = sshll.u32 %s2763_s22, 4  ;;  %s408_s23 = int_to_ptr.vmem [resolvable:$true] %s407_s23 }
  0x13   : > { %s2878_s24 = sadd.s32 4294967295, %s2761_s21   ;;  %p2063_p0 = scmp.ge.s32.totalorder %s2761_s21, 1 }
  0x14   : > { %p3464_p1 = scmp.eq.s32.totalorder %s2878_s24, 0  ;;  %p392_p2 = scmp.lt.s32.totalorder %s2761_s21, 5 }
  0x15   : > { %s2764_s26 = smov [#allocation8]   ;;  %s2765_s29 = smov [#allocation10]  }
  0x16   : > { %p2883_p3 = pnand %p2063_p0, %p392_p2  ;;  %s420_s27 = sshll.u32 %s2764_s26, 4  ;;  %s2895_s27 = int_to_ptr.vmem [resolvable:$true] %s420_s27 }
  0x17   : > { %s433_s30 = sshll.u32 %s2765_s29, 4  ;;  %s2532_s16 = scalar_lea.vmem %s408_s23, 2048  ;;  %s2897_s30 = int_to_ptr.vmem [resolvable:$true] %s433_s30 }
  0x18   : > { %s3477_s25 = scalar_select %p2883_p3, 1, 0 }
  0x19   : > { %p2424_p4 = pneg %p2883_p3  ;;  %p2533_p7 = scmp.ne.s32.totalorder %s408_s23, %s2532_s16 }
  0x1a   : > { %p2540_p10 = scmp.lt.s32.totalorder %s408_s23, %s408_s23  ;;  %p2541_p11 = scmp.lt.s32.totalorder %s2532_s16, %s2532_s16 }
  0x1b   : > { %p2891_p5 = pnand %p2424_p4, %p3464_p1 }
  0x1c   : > { %p2542_p12 = por %p2541_p11, %p2540_p10 }
  0x1d   : > { %p2523_p6 = pneg %p2891_p5 }
  0x1f   : > { %p2535_p8 = pnand %p2533_p7, %p2523_p6 }
  0x21   : > { %p2536_p9 = pneg %p2535_p8 }
  0x23   : > { %p2543_p13 = pnand %p2542_p12, %p2536_p9 }
  0x25   : > { %2546 = shalt.err (!%p2543_p13)
}
  0x26   : > { %s2766_s17 = smov 128   ;;  %s2767_s22 = smov 8  }
  0x27   : > { %s3479_s3 = sld [smem:[#allocation25_spill]]  ;;  %s2558_s15 = scalar_lea.vmem %s2895_s27, 2048 }
  0x28   : > { %p2559_p0 = scmp.ne.s32.totalorder %s2895_s27, %s2558_s15  ;;  %p2566_p7 = scmp.lt.s32.totalorder %s2895_s27, %s2895_s27 }
  0x29   : > { %p2567_p8 = scmp.lt.s32.totalorder %s2558_s15, %s2558_s15 }
  0x2a   : > { %p2561_p2 = pnand %p2559_p0, %p2523_p6 }
  0x2b   : > { %p2568_p9 = por %p2567_p8, %p2566_p7 }
  0x2c   : > { %p2562_p4 = pneg %p2561_p2 }
  0x2d   : > { %2427 = dma.hbm_to_vmem [thread:$0]  (!%p2891_p5), %s3479_s3, 2048, %s408_s23, [#allocation6], %s2766_s17, %s2766_s17, %s2767_s22  }
  0x2e   : > { %p2569_p10 = pnand %p2568_p9, %p2562_p4 }
  0x30   : > { %2572 = shalt.err (!%p2569_p10)
}
  0x31   : > { %s3480_s4 = sld [smem:[#allocation26_spill]]  ;;  %s2584_s26 = scalar_lea.vmem %s2897_s30, 2048 }
  0x32   : > { %p2585_p11 = scmp.ne.s32.totalorder %s2897_s30, %s2584_s26  ;;  %p2592_p0 = scmp.lt.s32.totalorder %s2897_s30, %s2897_s30 }
  0x33   : > { %p2593_p2 = scmp.lt.s32.totalorder %s2584_s26, %s2584_s26 }
  0x34   : > { %p2587_p12 = pnand %p2585_p11, %p2523_p6 }
  0x35   : > { %p2594_p4 = por %p2593_p2, %p2592_p0 }
  0x36   : > { %p2588_p13 = pneg %p2587_p12 }
  0x37   : > { %2430 = dma.hbm_to_vmem [thread:$0]  (!%p2891_p5), %s3480_s4, 2048, %s2895_s27, [#allocation9], %s2766_s17, %s2766_s17, %s2767_s22  }
  0x38   : > { %p2595_p7 = pnand %p2594_p4, %p2588_p13 }
  0x3a   : > { %2598 = shalt.err (!%p2595_p7)
}
  0x3b   : > { %s3481_s5 = sld [smem:[#allocation27_spill]]  ;;  %s2768_s29 = smov [#allocation11]  }
  0x3c   : > { %s461_s16 = sshll.u32 %s2768_s29, 4  ;;  %s462_s16 = int_to_ptr.vmem [resolvable:$true] %s461_s16 }
  0x3d   : > { %s2610_s23 = scalar_lea.vmem %s462_s16, 4096  ;;  %p2618_p11 = scmp.lt.s32.totalorder %s462_s16, %s462_s16 }
  0x3e   : > { %p2611_p8 = scmp.ne.s32.totalorder %s462_s16, %s2610_s23  ;;  %p2619_p12 = scmp.lt.s32.totalorder %s2610_s23, %s2610_s23 }
  0x40   : > { %p2613_p9 = pnand %p2611_p8, %p2523_p6  ;;  %p2620_p13 = por %p2619_p12, %p2618_p11 }
  0x41   : > { %2433 = dma.hbm_to_vmem [thread:$0]  (!%p2891_p5), %s3481_s5, 2048, %s2897_s30, [#allocation9], %s2766_s17, %s2766_s17, %s2767_s22  }
  0x42   : > { %p2614_p10 = pneg %p2613_p9 }
  0x44   : > { %p2621_p0 = pnand %p2620_p13, %p2614_p10 }
  0x46   : > { %2624 = shalt.err (!%p2621_p0)
}
  0x47   : > { %s3482_s11 = sld [smem:[#allocation28_spill]]  ;;  %s2062_s28 = sadd.s32 4294967294, %s2761_s21  }
  0x48   : > { %s2957_s15 = sadd.s32 1, %s2761_s21   ;;  %s43_s29 = sadd.s32 1, %s2757_s20 }
  0x49   : > { %3483 = sst [smem:[#allocation22_spill]] %s2957_s15  ;;  %s40_s27 = ssub.s32 %s2761_s21, %s2957_s15 }
  0x4a   : > { %p41_p6 = scmp.eq.s32.totalorder %s40_s27, 0  ;;  %p50_p2 = scmp.ne.s32.totalorder %s2757_s20, %s2753_s19 }
  0x4b   : > { %p51_p4 = scmp.eq.s32.totalorder %s2761_s21, 0  ;;  %p56_p7 = scmp.ne.s32.totalorder %s2753_s19, %s2749_s18 }
  0x4c   : > { %s2968_s23 = scalar_select %p41_p6, %s2757_s20, %s43_s29  }
  0x4d   : > { %2436 = dma.hbm_to_vmem [thread:$0]  (!%p2891_p5), %s3482_s11, 4096, %s462_s16, [#allocation12], %s2766_s17, %s2766_s17, %s2767_s22  }
  0x4e   : > { %3484 = sst [smem:[#allocation23_spill]] %s2968_s23  ;;  %p2970_p8 = por %p51_p4, %p50_p2 }
  0x4f   : > { %p2976_p5 = por %p3464_p1, %p56_p7  ;;  %p379_p9 = scmp.eq.s32.totalorder %s2878_s24, 3 }
  0x50   : > { %p385_p10 = scmp.eq.s32.totalorder %s2062_s28, 3  ;;  %p2452_p11 = scmp.lt.s32.totalorder %s2761_s21, 4 }
  0x51   : > { %s3486_s17 = scalar_select %p2976_p5, 1, 0 }
  0x52   : > { %s484_s22 = sand.u32 1, %s2757_s20   ;;  %p2983_p12 = por %p379_p9, %p50_p2 }
  0x53   : > { %p2987_p13 = por %p385_p10, %p56_p7  ;;  %s2991_s27 = sshll.u32 %s484_s22, 3 }
  0x54   : > { %s3487_s16 = scalar_select %p2983_p12, 1, 0 }
  0x55   : > { %s3488_s26 = scalar_select %p2987_p13, 1, 0 }
  0x56   : > { %s2070_s29 = sshll.u32 %s2761_s21, 7  ;;  %s488_s28 = scalar_lea.vmem [#allocation2], %s2991_s27 }
  0x57   : > { %3489 = sst [smem:[#allocation24_spill]] %s3488_s26  ;;  %s2997_s5 = scalar_lea.hbm %s3442_s0, %s2070_s29 }
  0x58   : > { %s495_s11 = sshll.u32 %s488_s28, 4  ;;  %p3004_p0 = pnand %p2452_p11, %p2970_p8  ;;  %s3000_s11 = int_to_ptr.vmem [resolvable:$true] %s495_s11 }
  0x59   : > { %s3011_s3 = scalar_lea.hbm %s3443_s1, %s2070_s29  ;;  %s502_s4 = sand.u32 1, %s2761_s21  }
  0x5a   : > { %s485_s26 = scalar_lea.sflag [#allocation3], %s484_s22  ;;  %s2625_s18 = scalar_lea.hbm %s2997_s5, 128 }
  0x5b   : > { %p2626_p6 = scmp.ne.s32.totalorder %s2997_s5, %s2625_s18  ;;  %p2627_p2 = pneg %p3004_p0 }
  0x5c   : > { %s2630_s14 = scalar_lea.hbm %s3442_s0, 512  ;;  %p2631_p8 = scmp.lt.s32.totalorder %s2997_s5, %s3442_s0 }
  0x5d   : > { %p2628_p4 = pnand %p2627_p2, %p2626_p6  ;;  %p2632_p9 = scmp.lt.s32.totalorder %s2630_s14, %s2625_s18 }
  0x5f   : > { %p2629_p7 = pneg %p2628_p4  ;;  %p2633_p10 = por %p2632_p9, %p2631_p8 }
  0x61   : > { %p2634_p11 = pnand %p2633_p10, %p2629_p7 }
  0x63   : > { %2637 = shalt.err (!%p2634_p11)
}
  0x64   : > { %s2638_s15 = scalar_lea.vmem %s3000_s11, 128  ;;  %s2769_s22 = smov [#allocation2]  }
  0x65   : > { %p2639_p1 = scmp.ne.s32.totalorder %s3000_s11, %s2638_s15  ;;  %s2643_s29 = sshll.u32 %s2769_s22, 4  ;;  %s2644_s29 = int_to_ptr.vmem [resolvable:$false] %s2643_s29 }
  0x66   : > { %s2645_s30 = scalar_lea.vmem %s2644_s29, 256  ;;  %p2646_p13 = scmp.lt.s32.totalorder %s3000_s11, %s2644_s29 }
  0x67   : > { %p2641_p6 = pnand %p2639_p1, %p2627_p2  ;;  %p2647_p12 = scmp.lt.s32.totalorder %s2645_s30, %s2638_s15 }
  0x69   : > { %p2642_p4 = pneg %p2641_p6  ;;  %p2648_p5 = por %p2647_p12, %p2646_p13 }
  0x6b   : > { %p2649_p8 = pnand %p2648_p5, %p2642_p4 }
  0x6d   : > { %2652 = shalt.err (!%p2649_p8)
}
  0x6e   : > { %2440 = dma.hbm_to_vmem [thread:$0]  (!%p3004_p0), %s2997_s5, 128, %s3000_s11, %s485_s26  }
  0x6f   : > { %s506_s13 = scalar_lea.vmem [#allocation5], %s2991_s27  ;;  %s503_s18 = scalar_lea.sflag [#allocation6], %s502_s4 }
  0x70   : > { %s513_s14 = sshll.u32 %s506_s13, 4  ;;  %s2653_s28 = scalar_lea.hbm %s3011_s3, 128  ;;  %s514_s14 = int_to_ptr.vmem [resolvable:$true] %s513_s14 }
  0x71   : > { %p2654_p1 = scmp.ne.s32.totalorder %s3011_s3, %s2653_s28  ;;  %s2658_s22 = scalar_lea.hbm %s3443_s1, 512 }
  0x72   : > { %p2659_p13 = scmp.lt.s32.totalorder %s3011_s3, %s3443_s1  ;;  %p2660_p7 = scmp.lt.s32.totalorder %s2658_s22, %s2653_s28 }
  0x73   : > { %p2656_p5 = pnand %p2654_p1, %p2627_p2 }
  0x74   : > { %p2661_p9 = por %p2660_p7, %p2659_p13 }
  0x75   : > { %p2657_p12 = pneg %p2656_p5 }
  0x77   : > { %p2662_p10 = pnand %p2661_p9, %p2657_p12 }
  0x79   : > { %2665 = shalt.err (!%p2662_p10)
}
  0x7a   : > { %s2666_s5 = scalar_lea.vmem %s514_s14, 128  ;;  %s2770_s11 = smov [#allocation5]  }
  0x7b   : > { %p2667_p11 = scmp.ne.s32.totalorder %s514_s14, %s2666_s5  ;;  %s2671_s26 = sshll.u32 %s2770_s11, 4  ;;  %s2672_s26 = int_to_ptr.vmem [resolvable:$false] %s2671_s26 }
  0x7c   : > { %s2673_s27 = scalar_lea.vmem %s2672_s26, 256  ;;  %p2674_p8 = scmp.lt.s32.totalorder %s514_s14, %s2672_s26 }
  0x7d   : > { %p2669_p6 = pnand %p2667_p11, %p2627_p2  ;;  %p2675_p1 = scmp.lt.s32.totalorder %s2673_s27, %s2666_s5 }
  0x7f   : > { %p2670_p4 = pneg %p2669_p6  ;;  %p2676_p5 = por %p2675_p1, %p2674_p8 }
  0x81   : > { %p2677_p3 = pnand %p2676_p5, %p2670_p4 }
  0x83   : > { %2680 = shalt.err (!%p2677_p3)
}
  0x84   : > { %2443 = dma.hbm_to_vmem [thread:$0]  (!%p3004_p0), %s3011_s3, 128, %s514_s14, %s503_s18  }
  0x85   : > { %p3491_p12 = scmp.ne.s32.totalorder %s3477_s25, 0 }
  0x86   : > { %s3062_s4 = sand.u32 (!%p3491_p12), 1, %s2753_s19   ;;  %p3492_p2 = scmp.ne.s32.totalorder (!%p3491_p12), %s3486_s17, 0 }
  0x87   : > { %522 = sbr.rel (%p3491_p12) target bundleno = 3330 (0xd02), region = 80  ;;  %s3065_s13 = sshll.u32 (!%p3491_p12), %s3062_s4, 3 }
  0x88   : > { %s525_s28 = scalar_lea.sflag (!%p3491_p12), [#allocation3], %s3062_s4  ;;  %s528_s20 = scalar_lea.vmem (!%p3491_p12), [#allocation2], %s3065_s13 }
  0x8c   : > { %2724 = dma.done.wait (%p3492_p2), %s525_s28, 128  }
  0x8d   : > { %2726 = vsyncadd (%p3492_p2), %s525_s28, 4294967168  ;;  %s533_s25 = sand.u32 1, %s2878_s24   ;;  %s537_s3 = scalar_lea.vmem [#allocation5], %s3065_s13 }
  0x8e   : > { %s534_s23 = scalar_lea.sflag [#allocation6], %s533_s25 }
  0x8f   : > { %2728 = dma.done.wait (%p3492_p2), %s534_s23, 128  }
  0x90   : > { %2730 = vsyncadd (%p3492_p2), %s534_s23, 4294967168  ;;  %p3493_p3 = scmp.eq.s32.totalorder %s2878_s24, 0 }
  0x92   : > { %2732 = dma.done.wait (%p3493_p3), [#allocation6], 2048   ;;  %p3494_p0 = pmov %p3493_p3 }
  0x94   : > { %2734 = vsyncadd (%p3494_p0), [#allocation6], 4294965248  ;;  %p3495_p13 = pmov %p3494_p0 }
  0x95   : > { %p3496_p7 = pmov %p3494_p0 }
  0x96   : > { %2736 = dma.done.wait (%p3495_p13), [#allocation9], 4096  }
  0x97   : > { %2738 = vsyncadd (%p3496_p7), [#allocation9], 4294963200  ;;  %p3497_p9 = pmov %p3494_p0 }
  0x98   : > { %p3498_p10 = pmov %p3494_p0 }
  0x99   : > { %2740 = dma.done.wait (%p3497_p9), [#allocation12], 4096  }
  0x9a   : > { %2742 = vsyncadd (%p3498_p10), [#allocation12], 4294963200  ;;  %v2771_v0 = vmov 0.0   ;;  %vm2772_vm0 = vmmov 0   ;;  %v708_v1 = vld [vmem:[#allocation7 + $0x78] sm:$0xff]  ;;  %v707_v3 = vld [vmem:[#allocation7 + $0x70] sm:$0xff] }
  0x9b   : > { %2257 = vmatprep.subr.mxu1 %v2771_v0  ;;  %2222 = vmatprep.subr.mxu0 %v2771_v0  ;;  %v622_v2 = vld [vmem:[%s3444_s2 + $0x78] sm:$0xff]  ;;  %v621_v4 = vld [vmem:[%s3444_s2 + $0x70] sm:$0xff]  ;;  %v706_v5 = vld [vmem:[#allocation7 + $0x68] sm:$0xff]  ;;  %vm865_vm1 = vcmask 261120   ;;  %vm942_vm2 = vcmask 64512   ;;  %s2775_s22 = smov 32  }
  0x9c   : > { %2289 = vmatprep.mubr.msk.f32.mxu1 %vm2772_vm0, %v2771_v0  ;;  %2254 = vmatprep.mubr.msk.f32.mxu0 %vm2772_vm0, %v2771_v0  ;;  %v620_v6 = vld [vmem:[%s3444_s2 + $0x68] sm:$0xff]  ;;  %v705_v7 = vld [vmem:[#allocation7 + $0x60] sm:$0xff]  ;;  %v704_v9 = vld [vmem:[#allocation7 + $0x58] sm:$0xff]  ;;  %vm1536_vm3 = vcmask 523264   ;;  %vm1538_vm4 = vcmask 785408   ;;  %s3499_s15 = sld [smem:[#allocation29_spill]] }
  0x9d   : > { %2258 = vmatpush3.msra.mxu1 %v708_v1  ;;  %2223 = vmatpush3.msra.mxu0 %v622_v2  ;;  %v619_v8 = vld [vmem:[%s3444_s2 + $0x60] sm:$0xff]  ;;  %v618_v10 = vld [vmem:[%s3444_s2 + $0x58] sm:$0xff]  ;;  %v703_v11 = vld [vmem:[#allocation7 + $0x50] sm:$0xff]  ;;  %s2100_s29 = sshll.u32 %s2878_s24, 7  ;;  %s604_s30 = scalar_lea.vmem [#allocation13], %s3065_s13 }
  0x9e   : > { %2259 = vmatprep.subr.mxu1 %v2771_v0  ;;  %2224 = vmatprep.subr.mxu0 %v2771_v0  ;;  %v617_v12 = vld [vmem:[%s3444_s2 + $0x50] sm:$0xff]  ;;  %v702_v13 = vld [vmem:[#allocation7 + $0x48] sm:$0xff]  ;;  %v701_v15 = vld [vmem:[#allocation7 + $0x40] sm:$0xff]  ;;  %s1931_s5 = sshll.u32 %s604_s30, 4  ;;  %s3501_s27 = sld [smem:[#allocation31_spill]]  ;;  %s1932_s5 = int_to_ptr.vmem [resolvable:$true] %s1931_s5 }
  0x9f   : > { %2260 = vmatpush3.msra.mxu1 %v707_v3  ;;  %2225 = vmatpush3.msra.mxu0 %v621_v4  ;;  %v616_v14 = vld [vmem:[%s3444_s2 + $0x48] sm:$0xff]  ;;  %v615_v16 = vld [vmem:[%s3444_s2 + $0x40] sm:$0xff]  ;;  %v700_v17 = vld [vmem:[#allocation7 + $0x38] sm:$0xff]  ;;  %s1918_s25 = scalar_lea.sflag [#allocation4], %s3062_s4  ;;  %s2681_s23 = scalar_lea.vmem %s1932_s5, 128 }
  0xa0   : > { %2261 = vmatprep.subr.mxu1 %v2771_v0  ;;  %2226 = vmatprep.subr.mxu0 %v2771_v0  ;;  %v614_v18 = vld [vmem:[%s3444_s2 + $0x38] sm:$0xff]  ;;  %v699_v19 = vld [vmem:[#allocation7 + $0x30] sm:$0xff]  ;;  %v698_v21 = vld [vmem:[#allocation7 + $0x28] sm:$0xff]  ;;  %p2682_p11 = scmp.ne.s32.totalorder %s1932_s5, %s2681_s23  ;;  %p3502_p6 = scmp.ne.s32.totalorder %s3487_s16, 0 }
  0xa1   : > { %2262 = vmatpush3.msra.mxu1 %v706_v5  ;;  %2227 = vmatpush3.msra.mxu0 %v620_v6  ;;  %v613_v20 = vld [vmem:[%s3444_s2 + $0x30] sm:$0xff]  ;;  %v612_v22 = vld [vmem:[%s3444_s2 + $0x28] sm:$0xff]  ;;  %v697_v23 = vld [vmem:[#allocation7 + $0x20] sm:$0xff]  ;;  %s2776_s17 = smov [#allocation13]  }
  0xa2   : > { %2263 = vmatprep.subr.mxu1 %v2771_v0  ;;  %2228 = vmatprep.subr.mxu0 %v2771_v0  ;;  %v611_v24 = vld [vmem:[%s3444_s2 + $0x20] sm:$0xff]  ;;  %v696_v25 = vld [vmem:[#allocation7 + $0x18] sm:$0xff]  ;;  %v695_v27 = vld [vmem:[#allocation7 + $0x10] sm:$0xff]  ;;  %p2683_p4 = pnand %p2682_p11, %p3502_p6  ;;  %s2685_s14 = sshll.u32 %s2776_s17, 4  ;;  %s2686_s14 = int_to_ptr.vmem [resolvable:$false] %s2685_s14 }
  0xa3   : > { %2264 = vmatpush3.msra.mxu1 %v705_v7  ;;  %2229 = vmatpush3.msra.mxu0 %v619_v8  ;;  %v610_v26 = vld [vmem:[%s3444_s2 + $0x18] sm:$0xff]  ;;  %v609_v28 = vld [vmem:[%s3444_s2 + $0x10] sm:$0xff]  ;;  %v694_v29 = vld [vmem:[#allocation7 + $0x8] sm:$0xff]  ;;  %s2687_s24 = scalar_lea.vmem %s2686_s14, 256  ;;  %p2688_p1 = scmp.lt.s32.totalorder %s1932_s5, %s2686_s14 }
  0xa4   : > { %2265 = vmatprep.subr.mxu1 %v2771_v0  ;;  %2230 = vmatprep.subr.mxu0 %v2771_v0  ;;  %v608_v30 = vld [vmem:[%s3444_s2 + $0x8] sm:$0xff]  ;;  %v693_v31 = vld [vmem:[#allocation7] sm:$0xff]  ;;  %v3175_v33 = vld [vmem:[%s537_s3] sm:$0xff]  ;;  %s2774_s3 = smov 64   ;;  %s1929_s28 = scalar_lea.hbm %s3501_s27, %s2100_s29 }
  0xa5   : > { %2266 = vmatpush3.msra.mxu1 %v704_v9  ;;  %2231 = vmatpush3.msra.mxu0 %v618_v10  ;;  %v607_v32 = vld [vmem:[%s3444_s2] sm:$0xff]  ;;  %v794_v35 = vld [vmem:[#allocation8 + $0x78] sm:$0xff]  ;;  %v793_v36 = vld [vmem:[#allocation8 + $0x70] sm:$0xff]  ;;  %p2684_p8 = pneg %p2683_p4  ;;  %p2689_p5 = scmp.lt.s32.totalorder %s2687_s24, %s2681_s23 }
  0xa6   : > { %2267 = vmatprep.subr.mxu1 %v2771_v0  ;;  %2232 = vmatprep.subr.mxu0 %v2771_v0  ;;  %v605_v34 = vld [vmem:[%s528_s20] sm:$0xff]  ;;  %v790_v39 = vld [vmem:[#allocation8 + $0x58] sm:$0xff]  ;;  %v789_v40 = vld [vmem:[#allocation8 + $0x50] sm:$0xff]  ;;  %s2773_s20 = smov 96  }
  0xa7   : > { %2268 = vmatpush3.msra.mxu1 %v703_v11  ;;  %2233 = vmatpush3.msra.mxu0 %v617_v12  ;;  %v792_v37 = vld [vmem:[#allocation8 + $0x68] sm:$0xff]  ;;  %v791_v38 = vld [vmem:[#allocation8 + $0x60] sm:$0xff]  ;;  %v786_v43 = vld [vmem:[#allocation8 + $0x38] sm:$0xff]  ;;  %p2690_p12 = por %p2689_p5, %p2688_p1 }
  0xa8   : > { %2269 = vmatprep.subr.mxu1 %v2771_v0  ;;  %2234 = vmatprep.subr.mxu0 %v2771_v0  ;;  %v788_v41 = vld [vmem:[#allocation8 + $0x48] sm:$0xff]  ;;  %v787_v42 = vld [vmem:[#allocation8 + $0x40] sm:$0xff]  ;;  %v785_v44 = vld [vmem:[#allocation8 + $0x30] sm:$0xff] }
  0xa9   : > { %2270 = vmatpush3.msra.mxu1 %v702_v13  ;;  %2235 = vmatpush3.msra.mxu0 %v616_v14  ;;  %v784_v45 = vld [vmem:[#allocation8 + $0x28] sm:$0xff]  ;;  %v783_v46 = vld [vmem:[#allocation8 + $0x20] sm:$0xff]  ;;  %v782_v47 = vld [vmem:[#allocation8 + $0x18] sm:$0xff]  ;;  %p2691_p2 = pnand %p2690_p12, %p2684_p8 }
  0xaa   : > { %2271 = vmatprep.subr.mxu1 %v2771_v0  ;;  %2236 = vmatprep.subr.mxu0 %v2771_v0  ;;  %v781_v48 = vld [vmem:[#allocation8 + $0x10] sm:$0xff]  ;;  %v780_v49 = vld [vmem:[#allocation8 + $0x8] sm:$0xff]  ;;  %v779_v50 = vld [vmem:[#allocation8] sm:$0xff] }
  0xab   : > { %2272 = vmatpush3.msra.mxu1 %v701_v15  ;;  %2237 = vmatpush3.msra.mxu0 %v615_v16 }
  0xac   : > { %2273 = vmatprep.subr.mxu1 %v2771_v0  ;;  %2238 = vmatprep.subr.mxu0 %v2771_v0 }
  0xad   : > { %2274 = vmatpush3.msra.mxu1 %v700_v17  ;;  %2239 = vmatpush3.msra.mxu0 %v614_v18 }
  0xae   : > { %2275 = vmatprep.subr.mxu1 %v2771_v0  ;;  %2240 = vmatprep.subr.mxu0 %v2771_v0 }
  0xaf   : > { %2276 = vmatpush3.msra.mxu1 %v699_v19  ;;  %2241 = vmatpush3.msra.mxu0 %v613_v20 }
  0xb0   : > { %2277 = vmatprep.subr.mxu1 %v2771_v0  ;;  %2242 = vmatprep.subr.mxu0 %v2771_v0 }
  0xb1   : > { %2278 = vmatpush3.msra.mxu1 %v698_v21  ;;  %2243 = vmatpush3.msra.mxu0 %v612_v22 }
  0xb2   : > { %2279 = vmatprep.subr.mxu1 %v2771_v0  ;;  %2244 = vmatprep.subr.mxu0 %v2771_v0 }
  0xb3   : > { %2280 = vmatpush3.msra.mxu1 %v697_v23  ;;  %2245 = vmatpush3.msra.mxu0 %v611_v24 }
  0xb4   : > { %2281 = vmatprep.subr.mxu1 %v2771_v0  ;;  %2246 = vmatprep.subr.mxu0 %v2771_v0 }
  0xb5   : > { %2282 = vmatpush3.msra.mxu1 %v696_v25  ;;  %2247 = vmatpush3.msra.mxu0 %v610_v26 }
  0xb6   : > { %2283 = vmatprep.subr.mxu1 %v2771_v0  ;;  %2248 = vmatprep.subr.mxu0 %v2771_v0 }
  0xb7   : > { %2284 = vmatpush3.msra.mxu1 %v695_v27  ;;  %2249 = vmatpush3.msra.mxu0 %v609_v28 }
  0xb8   : > { %2285 = vmatprep.subr.mxu1 %v2771_v0  ;;  %2250 = vmatprep.subr.mxu0 %v2771_v0 }
  0xb9   : > { %2286 = vmatpush3.msra.mxu1 %v694_v29  ;;  %2251 = vmatpush3.msra.mxu0 %v608_v30 }
  0xba   : > { %2287 = vmatprep.subr.mxu1 %v2771_v0  ;;  %2252 = vmatprep.subr.mxu0 %v2771_v0 }
  0xbb   : > { %2288 = vmatpush3.msra.mxu1 %v693_v31  ;;  %2253 = vmatpush3.msra.mxu0 %v607_v32 }
  0xbc   : > { %2290 = vmatmul.mubr.f32.vlgmr.msra.gmra.mxu1 %v3175_v33  ;;  %2255 = vmatmul.mubr.f32.vlgmr.msra.gmra.mxu0 %v605_v34 }
  0xbd   : > { %2292 = vmatprep.subr.mxu0 %v2771_v0  ;;  %2327 = vmatprep.subr.mxu1 %v2771_v0 }
  0xbe   : > { %2329 = vmatprep.mubr.msk.f32.mxu1 %vm2772_vm0, %v2771_v0  ;;  %2324 = vmatprep.mubr.msk.f32.mxu0 %vm2772_vm0, %v2771_v0 }
  0xbf   : > { %2293 = vmatpush3.msra.mxu0 %v794_v35 }
  0xc0   : > { %2294 = vmatprep.subr.mxu0 %v2771_v0 }
  0xc1   : > { %2295 = vmatpush3.msra.mxu0 %v793_v36 }
  0xc2   : > { %2296 = vmatprep.subr.mxu0 %v2771_v0 }
  0xc3   : > { %2297 = vmatpush3.msra.mxu0 %v792_v37 }
  0xc4   : > { %2298 = vmatprep.subr.mxu0 %v2771_v0 }
  0xc5   : > { %2299 = vmatpush3.msra.mxu0 %v791_v38 }
  0xc6   : > { %2300 = vmatprep.subr.mxu0 %v2771_v0 }
  0xc7   : > { %2301 = vmatpush3.msra.mxu0 %v790_v39 }
  0xc8   : > { %2302 = vmatprep.subr.mxu0 %v2771_v0 }
  0xc9   : > { %2303 = vmatpush3.msra.mxu0 %v789_v40 }
  0xca   : > { %2304 = vmatprep.subr.mxu0 %v2771_v0 }
  0xcb   : > { %2305 = vmatpush3.msra.mxu0 %v788_v41 }
  0xcc   : > { %2306 = vmatprep.subr.mxu0 %v2771_v0 }
  0xcd   : > { %2307 = vmatpush3.msra.mxu0 %v787_v42 }
  0xce   : > { %2308 = vmatprep.subr.mxu0 %v2771_v0 }
  0xcf   : > { %2309 = vmatpush3.msra.mxu0 %v786_v43 }
  0xd0   : > { %2310 = vmatprep.subr.mxu0 %v2771_v0 }
  0xd1   : > { %2311 = vmatpush3.msra.mxu0 %v785_v44 }
  0xd2   : > { %2312 = vmatprep.subr.mxu0 %v2771_v0 }
  0xd3   : > { %2313 = vmatpush3.msra.mxu0 %v784_v45 }
  0xd4   : > { %2314 = vmatprep.subr.mxu0 %v2771_v0 }
  0xd5   : > { %2315 = vmatpush3.msra.mxu0 %v783_v46 }
  0xd6   : > { %2316 = vmatprep.subr.mxu0 %v2771_v0 }
  0xd7   : > { %2317 = vmatpush3.msra.mxu0 %v782_v47 }
  0xd8   : > { %2318 = vmatprep.subr.mxu0 %v2771_v0 }
  0xd9   : > { %2319 = vmatpush3.msra.mxu0 %v781_v48  ;;  %v1555_v48 = vld [vmem:[#allocation10 + $0x78] sm:$0xff] }
  0xda   : > { %2320 = vmatprep.subr.mxu0 %v2771_v0 }
  0xdb   : > { %2321 = vmatpush3.msra.mxu0 %v780_v49  ;;  %v1554_v49 = vld [vmem:[#allocation10 + $0x70] sm:$0xff] }
  0xdc   : > { %2322 = vmatprep.subr.mxu0 %v2771_v0 }
  0xdd   : > { %2323 = vmatpush3.msra.mxu0 %v779_v50  ;;  %v1553_v50 = vld [vmem:[#allocation10 + $0x68] sm:$0xff] }
  0xde   : > { %2325 = vmatmul.mubr.f32.vlgmr.msra.gmra.mxu0 %v3175_v33  ;;  %2367 = vmatprep.subr.mxu0 %v2771_v0 }
  0xdf   : > { %2399 = vmatprep.mubr.msk.f32.mxu0 %vm2772_vm0, %v2771_v0  ;;  %2368 = vmatpush3.msra.mxu0 %v1555_v48  ;;  %v1668_v48 = vld [vmem:[%s3451_s9 + $0x30] sm:$0xff] }
  0xe0   : > { %2369 = vmatprep.subr.mxu0 %v2771_v0 }
  0xe1   : > { %2370 = vmatpush3.msra.mxu0 %v1554_v49  ;;  %v1667_v49 = vld [vmem:[%s3451_s9 + $0x28] sm:$0xff] }
  0xe2   : > { %2371 = vmatprep.subr.mxu0 %v2771_v0 }
  0xe3   : > { %2372 = vmatpush3.msra.mxu0 %v1553_v50  ;;  %v1666_v50 = vld [vmem:[%s3451_s9 + $0x20] sm:$0xff] }
  0xe4   : > { %2373 = vmatprep.subr.mxu0 %v2771_v0 }
 0x17c   : > { %v775_v51 = vpop.f32.mrf.mxu1  ;;  %v689_v52 = vpop.f32.mrf.mxu0 }
 0x17d   : > { %2328 = vmatpush3.xpose.msk.msra.mxu1 %vm865_vm1, %v775_v51  ;;  %1027 = vrot.lane.b32.xlu1 %v689_v52, %s2773_s20 }
 0x17e   : > { %v2291_v53 = vpop.f32.mrf.mxu1  ;;  %v2256_v54 = vpop.f32.mrf.mxu0  ;;  %2332 = vmatprep.subr.mxu1 %v2771_v0 }
 0x17f   : > { %v1550_v53 = vld [vmem:[#allocation10 + $0x50] sm:$0xff]  ;;  %v1549_v54 = vld [vmem:[#allocation10 + $0x48] sm:$0xff] }
 0x180   : > { %2330 = vmatmul.mubr.msk.f32.vlgmr.msra.gmra.mxu1 %vm865_vm1, %v689_v52 }
 0x181   : > { %2334 = vmatprep.mubr.msk.f32.mxu1 %vm2772_vm0, %v2771_v0 }
 0x19e   : > { %v861_v55 = vpop.f32.mrf.mxu0 }
 0x19f   : > { %2333 = vmatpush3.msra.mxu1 %v861_v55 }
 0x1a0   : > { %v2326_v56 = vpop.f32.mrf.mxu0  ;;  %2337 = vmatprep.subr.mxu1 %v2771_v0 }
 0x1a1   : > { %v1547_v56 = vld [vmem:[#allocation10 + $0x38] sm:$0xff] }
 0x1ef   : > { %v1028_v2 = vpop.permute.xlu1 %1027 }
 0x240   : > { %v938_v57 = vpop.f32.mrf.mxu1 }
 0x241   : > { %v943_v58 = vsel %vm942_vm2, %v938_v57, -inf }
 0x242   : > { %944 = vmax.xlane.f32.xlu0 %v943_v58  ;;  %v2331_v59 = vpop.f32.mrf.mxu1  ;;  %v1545_v58 = vld [vmem:[#allocation10 + $0x28] sm:$0xff] }
 0x243   : > { %v1544_v59 = vld [vmem:[#allocation10 + $0x20] sm:$0xff] }
 0x258   : > { %1029 = vrot.lane.b32.xlu0 %v775_v51, %s2773_s20 }
 0x25c   : > { %1115 = vrot.lane.b32.xlu0 %v861_v55, %s2773_s20 }
 0x260   : > { %1195 = vrot.lane.b32.xlu0 %v775_v51, %s2774_s3 }
 0x264   : > { %1193 = vrot.lane.b32.xlu0 %v689_v52, %s2774_s3 }
 0x2cb   : > { %v945_v60 = vpop.xlane.xlu0 %944 }
 0x2cc   : > { %v946_v61 = vsub.f32 %v938_v57, %v945_v60  ;;  %v1546_v57 = vld [vmem:[#allocation10 + $0x30] sm:$0xff]  ;;  %v1543_v60 = vld [vmem:[#allocation10 + $0x18] sm:$0xff] }
 0x2ce   : > { %v947_v62 = vmul.f32 1.442695, %v946_v61  ;;  %v1542_v61 = vld [vmem:[#allocation10 + $0x10] sm:$0xff] }
 0x2cf   : > { %v1030_v63 = vpop.permute.xlu0 %1029 }
 0x2d0   : > { %2501 = vpow2.f32 %v947_v62  ;;  %v1541_v62 = vld [vmem:[#allocation10 + $0x8] sm:$0xff] }
 0x2d3   : > { %v1116_v3 = vpop.permute.xlu0 %1115 }
 0x2d7   : > { %v1196_v12 = vpop.permute.xlu0 %1195 }
 0x2db   : > { %v1194_v14 = vpop.permute.xlu0 %1193 }
 0x2dd   : > { %v3219_v1 = vpop.eup %2501 }
 0x2de   : > { %2335 = vmatmul.mubr.msk.f32.vlgmr.msra.gmra.mxu1 %vm942_vm2, %v3219_v1  ;;  %v949_v45 = vsel %vm942_vm2, %v3219_v1, 0.0  ;;  %v1540_v1 = vld [vmem:[#allocation10] sm:$0xff] }
 0x2df   : > { %2338 = vmatpush3.xpose.msk.msra.mxu1 %vm865_vm1, %v1030_v63  ;;  %2339 = vmatprep.mubr.msk.f32.mxu1 %vm2772_vm0, %v2771_v0 }
 0x2e0   : > { %2342 = vmatprep.subr.mxu1 %v2771_v0 }
 0x2e2   : > { %2340 = vmatmul.mubr.msk.f32.vlgmr.msra.gmra.mxu1 %vm865_vm1, %v1028_v2 }
 0x2e3   : > { %2343 = vmatpush3.msra.mxu1 %v1116_v3  ;;  %2344 = vmatprep.mubr.msk.f32.mxu1 %vm2772_vm0, %v2771_v0 }
 0x2e4   : > { %2347 = vmatprep.subr.mxu1 %v2771_v0 }
 0x39e   : > { %v3231_v4 = vpop.f32.mrf.mxu1 }
 0x3a0   : > { %v2336_v5 = vpop.f32.mrf.mxu1 }
 0x3a2   : > { %v1101_v6 = vpop.f32.mrf.mxu1 }
 0x3a3   : > { %v1105_v7 = vsel %vm942_vm2, %v1101_v6, -inf }
 0x3a4   : > { %1106 = vmax.xlane.f32.xlu1 %v1105_v7  ;;  %v2341_v8 = vpop.f32.mrf.mxu1 }
 0x3b5   : > { %1280 = vrot.lane.b32.xlu1 %v861_v55, %s2774_s3 }
 0x3b9   : > { %1360 = vrot.lane.b32.xlu1 %v775_v51, %s2775_s22  ;;  %v1552_v51 = vld [vmem:[#allocation10 + $0x60] sm:$0xff] }
 0x3ba   : > { %2374 = vmatpush3.msra.mxu0 %v1552_v51  ;;  %v1665_v51 = vld [vmem:[%s3451_s9 + $0x18] sm:$0xff] }
 0x3bb   : > { %2375 = vmatprep.subr.mxu0 %v2771_v0 }
 0x3bd   : > { %1358 = vrot.lane.b32.xlu1 %v689_v52, %s2775_s22  ;;  %v1551_v52 = vld [vmem:[#allocation10 + $0x58] sm:$0xff] }
 0x3be   : > { %2376 = vmatpush3.msra.mxu0 %v1551_v52  ;;  %v1664_v52 = vld [vmem:[%s3451_s9 + $0x10] sm:$0xff] }
 0x3bf   : > { %2377 = vmatprep.subr.mxu0 %v2771_v0 }
 0x3c0   : > { %2378 = vmatpush3.msra.mxu0 %v1550_v53  ;;  %v1663_v53 = vld [vmem:[%s3451_s9 + $0x8] sm:$0xff] }
 0x3c1   : > { %2379 = vmatprep.subr.mxu0 %v2771_v0 }
 0x3c2   : > { %2380 = vmatpush3.msra.mxu0 %v1549_v54  ;;  %v1662_v54 = vld [vmem:[%s3451_s9] sm:$0xff] }
 0x3c3   : > { %2381 = vmatprep.subr.mxu0 %v2771_v0 }
 0x42d   : > { %v1107_v9 = vpop.xlane.xlu1 %1106 }
 0x42e   : > { %v1108_v10 = vsub.f32 %v1101_v6, %v1107_v9 }
 0x430   : > { %v1109_v11 = vmul.f32 1.442695, %v1108_v10 }
 0x431   : > { %v1281_v15 = vpop.permute.xlu1 %1280 }
 0x432   : > { %2503 = vpow2.f32 %v1109_v11 }
 0x435   : > { %v1361_v25 = vpop.permute.xlu1 %1360 }
 0x439   : > { %v1359_v27 = vpop.permute.xlu1 %1358 }
 0x43f   : > { %v2504_v13 = vpop.eup %2503 }
 0x440   : > { %2345 = vmatmul.mubr.msk.f32.vlgmr.msra.gmra.mxu1 %vm942_vm2, %v2504_v13  ;;  %v1111_v21 = vsel %vm942_vm2, %v2504_v13, 0.0 }
 0x441   : > { %2348 = vmatpush3.xpose.msk.msra.mxu1 %vm865_vm1, %v1196_v12  ;;  %2349 = vmatprep.mubr.msk.f32.mxu1 %vm2772_vm0, %v2771_v0 }
 0x442   : > { %2352 = vmatprep.subr.mxu1 %v2771_v0 }
 0x444   : > { %2350 = vmatmul.mubr.msk.f32.vlgmr.msra.gmra.mxu1 %vm865_vm1, %v1194_v14 }
 0x445   : > { %2353 = vmatpush3.msra.mxu1 %v1281_v15  ;;  %2354 = vmatprep.mubr.msk.f32.mxu1 %vm2772_vm0, %v2771_v0  ;;  %v2093_v15 = vld [vmem:[%s3448_s6] ss:$0 sm:$0xff] }
 0x446   : > { %2357 = vmatprep.subr.mxu1 %v2771_v0 }
 0x500   : > { %v1187_v16 = vpop.f32.mrf.mxu1 }
 0x502   : > { %v2346_v17 = vpop.f32.mrf.mxu1 }
 0x504   : > { %v1267_v18 = vpop.f32.mrf.mxu1 }
 0x505   : > { %v1271_v19 = vsel %vm942_vm2, %v1267_v18, -inf }
 0x506   : > { %1272 = vmax.xlane.f32.xlu0 %v1271_v19  ;;  %v2351_v20 = vpop.f32.mrf.mxu1 }
 0x507   : > { %v1692_v20 = vld [vmem:[%s3451_s9 + $0xf0] sm:$0xff] }
 0x51c   : > { %1445 = vrot.lane.b32.xlu0 %v861_v55, %s2775_s22  ;;  %v1548_v55 = vld [vmem:[#allocation10 + $0x40] sm:$0xff] }
 0x51d   : > { %2382 = vmatpush3.msra.mxu0 %v1548_v55  ;;  %v1810_v55 = vld [vmem:[#allocation11 + $0xf8] sm:$0xff] }
 0x51e   : > { %2383 = vmatprep.subr.mxu0 %v2771_v0 }
 0x51f   : > { %2384 = vmatpush3.msra.mxu0 %v1547_v56  ;;  %v1794_v56 = vld [vmem:[#allocation11 + $0x78] sm:$0xff] }
 0x520   : > { %2385 = vmatprep.subr.mxu0 %v2771_v0 }
 0x521   : > { %2386 = vmatpush3.msra.mxu0 %v1546_v57  ;;  %v1809_v57 = vld [vmem:[#allocation11 + $0xf0] sm:$0xff] }
 0x522   : > { %2387 = vmatprep.subr.mxu0 %v2771_v0 }
 0x523   : > { %2388 = vmatpush3.msra.mxu0 %v1545_v58  ;;  %v1793_v58 = vld [vmem:[#allocation11 + $0x70] sm:$0xff] }
 0x524   : > { %2389 = vmatprep.subr.mxu0 %v2771_v0 }
 0x525   : > { %2390 = vmatpush3.msra.mxu0 %v1544_v59  ;;  %v1808_v59 = vld [vmem:[#allocation11 + $0xe8] sm:$0xff] }
 0x526   : > { %2391 = vmatprep.subr.mxu0 %v2771_v0 }
 0x527   : > { %2392 = vmatpush3.msra.mxu0 %v1543_v60  ;;  %v1792_v60 = vld [vmem:[#allocation11 + $0x68] sm:$0xff] }
 0x528   : > { %2393 = vmatprep.subr.mxu0 %v2771_v0 }
 0x529   : > { %2394 = vmatpush3.msra.mxu0 %v1542_v61  ;;  %v1807_v61 = vld [vmem:[#allocation11 + $0xe0] sm:$0xff] }
 0x52a   : > { %2395 = vmatprep.subr.mxu0 %v2771_v0 }
 0x52b   : > { %2396 = vmatpush3.msra.mxu0 %v1541_v62  ;;  %v1791_v62 = vld [vmem:[#allocation11 + $0x60] sm:$0xff] }
 0x52c   : > { %2397 = vmatprep.subr.mxu0 %v2771_v0 }
 0x52d   : > { %2398 = vmatpush3.msra.mxu0 %v1540_v1  ;;  %v1790_v1 = vld [vmem:[#allocation11 + $0x58] sm:$0xff] }
 0x52e   : > { %2187 = vmatprep.subr.mxu0 %v1810_v55 }
 0x53b   : > { %1112 = vadd.xlane.f32.xlu0 %v1111_v21  ;;  %v1691_v21 = vld [vmem:[%s3451_s9 + $0xe8] sm:$0xff] }
 0x58f   : > { %v1273_v22 = vpop.xlane.xlu0 %1272 }
 0x590   : > { %v1274_v23 = vsub.f32 %v1267_v18, %v1273_v22  ;;  %v1690_v22 = vld [vmem:[%s3451_s9 + $0xe0] sm:$0xff] }
 0x592   : > { %v1275_v24 = vmul.f32 1.442695, %v1274_v23  ;;  %v1688_v23 = vld [vmem:[%s3451_s9 + $0xd0] sm:$0xff] }
 0x593   : > { %v1446_v28 = vpop.permute.xlu0 %1445 }
 0x594   : > { %2505 = vpow2.f32 %v1275_v24  ;;  %v1687_v24 = vld [vmem:[%s3451_s9 + $0xc8] sm:$0xff] }
 0x5a1   : > { %v2506_v26 = vpop.eup %2505 }
 0x5a2   : > { %2355 = vmatmul.mubr.msk.f32.vlgmr.msra.gmra.mxu1 %vm942_vm2, %v2506_v26  ;;  %v1277_v35 = vsel %vm942_vm2, %v2506_v26, 0.0 }
 0x5a3   : > { %2358 = vmatpush3.xpose.msk.msra.mxu1 %vm865_vm1, %v1361_v25  ;;  %2359 = vmatprep.mubr.msk.f32.mxu1 %vm2772_vm0, %v2771_v0  ;;  %v1686_v25 = vld [vmem:[%s3451_s9 + $0xc0] sm:$0xff] }
 0x5a4   : > { %2362 = vmatprep.subr.mxu1 %v2771_v0 }
 0x5a6   : > { %2360 = vmatmul.mubr.msk.f32.vlgmr.msra.gmra.mxu1 %vm865_vm1, %v1359_v27 }
 0x5a7   : > { %2363 = vmatpush3.msra.mxu1 %v1446_v28  ;;  %2364 = vmatprep.mubr.msk.f32.mxu1 %vm2772_vm0, %v2771_v0 }
 0x5c4   : > { %v1113_v43 = vpop.xlane.xlu0 %1112 }
 0x662   : > { %v1352_v29 = vpop.f32.mrf.mxu1 }
 0x664   : > { %v2356_v30 = vpop.f32.mrf.mxu1 }
 0x665   : > { %v1685_v30 = vld [vmem:[%s3451_s9 + $0xb8] sm:$0xff] }
 0x666   : > { %v1432_v31 = vpop.f32.mrf.mxu1 }
 0x667   : > { %v1436_v32 = vsel %vm942_vm2, %v1432_v31, -inf }
 0x668   : > { %1437 = vmax.xlane.f32.xlu1 %v1436_v32  ;;  %v2361_v34 = vpop.f32.mrf.mxu1  ;;  %v1683_v32 = vld [vmem:[%s3451_s9 + $0xa8] sm:$0xff] }
 0x669   : > { %v1682_v34 = vld [vmem:[%s3451_s9 + $0xa0] sm:$0xff] }
 0x66c   : > { %1278 = vadd.xlane.f32.xlu1 %v1277_v35  ;;  %v1681_v35 = vld [vmem:[%s3451_s9 + $0x98] sm:$0xff] }
 0x6f1   : > { %v1438_v36 = vpop.xlane.xlu1 %1437 }
 0x6f2   : > { %v1439_v37 = vsub.f32 %v1432_v31, %v1438_v36  ;;  %v1684_v31 = vld [vmem:[%s3451_s9 + $0xb0] sm:$0xff] }
 0x6f3   : > { %v1680_v36 = vld [vmem:[%s3451_s9 + $0x90] sm:$0xff] }
 0x6f4   : > { %v1440_v38 = vmul.f32 1.442695, %v1439_v37  ;;  %v1679_v37 = vld [vmem:[%s3451_s9 + $0x88] sm:$0xff] }
 0x6f5   : > { %v1279_v39 = vpop.xlane.xlu1 %1278 }
 0x6f6   : > { %2507 = vpow2.f32 %v1440_v38  ;;  %v1678_v38 = vld [vmem:[%s3451_s9 + $0x80] sm:$0xff] }
 0x6f7   : > { %2509 = vrcp.f32 %v1279_v39  ;;  %v1677_v39 = vld [vmem:[%s3451_s9 + $0x78] sm:$0xff] }
 0x6f8   : > { %2511 = vrcp.f32 %v1113_v43  ;;  %v1673_v43 = vld [vmem:[%s3451_s9 + $0x58] sm:$0xff] }
 0x703   : > { %v2508_v40 = vpop.eup %2507 }
 0x704   : > { %v2510_v41 = vpop.eup %2509  ;;  %2365 = vmatmul.mubr.msk.f32.vlgmr.msra.gmra.mxu1 %vm942_vm2, %v2508_v40  ;;  %v1442_v42 = vsel %vm942_vm2, %v2508_v40, 0.0  ;;  %v1676_v40 = vld [vmem:[%s3451_s9 + $0x70] sm:$0xff] }
 0x705   : > { %1443 = vadd.xlane.f32.xlu1 %v1442_v42  ;;  %v1357_v44 = vmul.f32 %v2510_v41, %v1352_v29  ;;  %1770 = vmatprep.mubr.f32.mxu1 %v2771_v0  ;;  %v2512_v46 = vpop.eup %2511  ;;  %v1675_v41 = vld [vmem:[%s3451_s9 + $0x68] sm:$0xff]  ;;  %v1674_v42 = vld [vmem:[%s3451_s9 + $0x60] sm:$0xff] }
 0x706   : > { %v1192_v47 = vmul.f32 %v2512_v46, %v1187_v16  ;;  %v1670_v46 = vld [vmem:[%s3451_s9 + $0x40] sm:$0xff] }
 0x707   : > { %1528 = vrot.lane.b32.xlu0 %v1357_v44, %s2774_s3  ;;  %v1672_v44 = vld [vmem:[%s3451_s9 + $0x50] sm:$0xff] }
 0x709   : > { %950 = vadd.xlane.f32.xlu1 %v949_v45  ;;  %v1671_v45 = vld [vmem:[%s3451_s9 + $0x48] sm:$0xff] }
 0x71a   : > { %1524 = vrot.lane.b32.xlu1 %v1192_v47, %s2775_s22  ;;  %v1669_v47 = vld [vmem:[%s3451_s9 + $0x38] sm:$0xff]  ;;  %s3500_s22 = sld [smem:[#allocation30_spill]] }
 0x779   : > { %v1529_v0 = vpop.permute.xlu0 %1528 }
 0x78e   : > { %v1444_v63 = vpop.xlane.xlu1 %1443 }
 0x78f   : > { %2513 = vrcp.f32 %v1444_v63  ;;  %v1806_v63 = vld [vmem:[#allocation11 + $0xd8] sm:$0xff] }
 0x792   : > { %v951_v7 = vpop.xlane.xlu1 %950 }
 0x793   : > { %2515 = vrcp.f32 %v951_v7  ;;  %v1803_v7 = vld [vmem:[#allocation11 + $0xc0] sm:$0xff] }
 0x796   : > { %v1525_v10 = vpop.permute.xlu1 %1524 }
 0x79c   : > { %v2514_v2 = vpop.eup %2513 }
 0x7a0   : > { %v2516_v8 = vpop.eup %2515 }
 0x7a1   : > { %v1026_v9 = vmul.f32 %v2516_v8, %v3231_v4  ;;  %v1693_v4 = vld [vmem:[%s3451_s9 + $0xf8] sm:$0xff]  ;;  %v1787_v8 = vld [vmem:[#allocation11 + $0x40] sm:$0xff] }
 0x7a2   : > { %1706 = vmatprep.subr.mxu1 %v1693_v4  ;;  %v2094_v4 = vld [vmem:[%s3449_s7] ss:$0 sm:$0xff] }
 0x7a3   : > { %v1535_v11 = vsel %vm865_vm1, %v1026_v9, %v1525_v10  ;;  %1707 = vmatpush1.msra.mxu1 %v1692_v20  ;;  %v1802_v9 = vld [vmem:[#allocation11 + $0xb8] sm:$0xff] }
 0x7a4   : > { %v1537_v12 = vsel %vm1536_vm3, %v1535_v11, %v1529_v0  ;;  %1708 = vmatprep.subr.mxu1 %v1691_v21  ;;  %v1786_v10 = vld [vmem:[#allocation11 + $0x38] sm:$0xff]  ;;  %v1801_v11 = vld [vmem:[#allocation11 + $0xb0] sm:$0xff]  ;;  %v2095_v21 = vld [vmem:[%s3450_s8] ss:$0 sm:$0xff] }
 0x7a5   : > { %1709 = vmatpush1.msra.mxu1 %v1690_v22  ;;  %v1785_v0 = vld [vmem:[#allocation11 + $0x30] sm:$0xff] }
 0x7c4   : > { %v1517_v3 = vpop.f32.mrf.mxu1 }
 0x7c5   : > { %v1522_v5 = vmul.f32 %v2514_v2, %v1517_v3  ;;  %v1805_v2 = vld [vmem:[#allocation11 + $0xd0] sm:$0xff] }
 0x7c6   : > { %v2366_v6 = vpop.f32.mrf.mxu1  ;;  %v1789_v3 = vld [vmem:[#allocation11 + $0x50] sm:$0xff] }
 0x7c7   : > { %1532 = vrot.lane.b32.xlu1 %v1522_v5, %s2773_s20  ;;  %v1804_v5 = vld [vmem:[#allocation11 + $0xc8] sm:$0xff] }
 0x7c8   : > { %v1788_v6 = vld [vmem:[#allocation11 + $0x48] sm:$0xff] }
 0x839   : > { %v1533_v13 = vpop.permute.xlu1 %1532 }
 0x83a   : > { %v1539_v14 = vsel %vm1538_vm4, %v1537_v12, %v1533_v13  ;;  %v1800_v12 = vld [vmem:[#allocation11 + $0xa8] sm:$0xff] }
 0x83b   : > { %2400 = vmatmul.mubr.f32.vlgmr.msra.gmra.mxu0 %v1539_v14  ;;  %v1784_v13 = vld [vmem:[#allocation11 + $0x28] sm:$0xff]  ;;  %v1799_v14 = vld [vmem:[#allocation11 + $0xa0] sm:$0xff] }
 0x83c   : > { %2188 = vmatpush3.msra.mxu0 %v1794_v56 }
 0x83d   : > { %2189 = vmatprep.subr.mxu0 %v1809_v57 }
 0x83e   : > { %2190 = vmatpush3.msra.mxu0 %v1793_v58 }
 0x83f   : > { %2191 = vmatprep.subr.mxu0 %v1808_v59  ;;  %v2097_v59 = vld [vmem:[%s3499_s15] ss:$0 sm:$0xff] }
 0x840   : > { %2192 = vmatpush3.msra.mxu0 %v1792_v60 }
 0x841   : > { %2193 = vmatprep.subr.mxu0 %v1807_v61  ;;  %v2098_v61 = vld [vmem:[%s3500_s22] ss:$0 sm:$0xff] }
 0x842   : > { %2194 = vmatpush3.msra.mxu0 %v1791_v62 }
 0x843   : > { %2195 = vmatprep.subr.mxu0 %v1806_v63 }
 0x844   : > { %2196 = vmatpush3.msra.mxu0 %v1790_v1 }
 0x845   : > { %2197 = vmatprep.subr.mxu0 %v1805_v2 }
 0x846   : > { %2198 = vmatpush3.msra.mxu0 %v1789_v3 }
 0x847   : > { %2199 = vmatprep.subr.mxu0 %v1804_v5 }
 0x848   : > { %2200 = vmatpush3.msra.mxu0 %v1788_v6 }
 0x849   : > { %2201 = vmatprep.subr.mxu0 %v1803_v7 }
 0x84a   : > { %2202 = vmatpush3.msra.mxu0 %v1787_v8 }
 0x84b   : > { %2203 = vmatprep.subr.mxu0 %v1802_v9 }
 0x84c   : > { %2204 = vmatpush3.msra.mxu0 %v1786_v10 }
 0x84d   : > { %2205 = vmatprep.subr.mxu0 %v1801_v11 }
 0x84e   : > { %2206 = vmatpush3.msra.mxu0 %v1785_v0 }
 0x84f   : > { %2207 = vmatprep.subr.mxu0 %v1800_v12 }
 0x850   : > { %2208 = vmatpush3.msra.mxu0 %v1784_v13 }
 0x851   : > { %2209 = vmatprep.subr.mxu0 %v1799_v14 }
 0x8fb   : > { %v1629_v16 = vpop.f32.mrf.mxu0 }
 0x8fc   : > { %v1630_v17 = vadd.f32 %v2093_v15, %v1629_v16  ;;  %v1783_v15 = vld [vmem:[#allocation11 + $0x20] sm:$0xff] }
 0x8fd   : > { %v2401_v18 = vpop.f32.mrf.mxu0  ;;  %2210 = vmatpush3.msra.mxu0 %v1783_v15 }
 0x8fe   : > { %v1633_v19 = vadd.f32 %v1630_v17, %v3175_v33  ;;  %v1689_v33 = vld [vmem:[%s3451_s9 + $0xd8] sm:$0xff] }
 0x8ff   : > { %1710 = vmatprep.subr.mxu1 %v1689_v33 }
 0x900   : > { %1636 = vadd.xlane.f32.xlu1 %v1633_v19  ;;  %1711 = vmatpush1.msra.mxu1 %v1688_v23  ;;  %v1798_v23 = vld [vmem:[#allocation11 + $0x98] sm:$0xff] }
 0x901   : > { %1712 = vmatprep.subr.mxu1 %v1687_v24  ;;  %2211 = vmatprep.subr.mxu0 %v1798_v23  ;;  %v1782_v24 = vld [vmem:[#allocation11 + $0x18] sm:$0xff] }
 0x902   : > { %1713 = vmatpush1.msra.mxu1 %v1686_v25  ;;  %2212 = vmatpush3.msra.mxu0 %v1782_v24  ;;  %v1797_v25 = vld [vmem:[#allocation11 + $0x90] sm:$0xff] }
 0x903   : > { %1714 = vmatprep.subr.mxu1 %v1685_v30  ;;  %2213 = vmatprep.subr.mxu0 %v1797_v25  ;;  %v1795_v30 = vld [vmem:[#allocation11 + $0x80] sm:$0xff] }
 0x904   : > { %1715 = vmatpush1.msra.mxu1 %v1684_v31  ;;  %v1696_v31 = vlaneseq }
 0x905   : > { %1716 = vmatprep.subr.mxu1 %v1683_v32 }
 0x906   : > { %1717 = vmatpush1.msra.mxu1 %v1682_v34  ;;  %v1697_v32 = vshrl.u32 %v1696_v31, 7 }
 0x907   : > { %1718 = vmatprep.subr.mxu1 %v1681_v35  ;;  %v1694_v35 = vld [vmem:[%s3452_s10] sm:$0x3] }
 0x908   : > { %1719 = vmatpush1.msra.mxu1 %v1680_v36  ;;  %v1698_v34 = vsub.s32 0, %v1697_v32  ;;  %v1702_v36 = vsub.s32 1, %v1697_v32 }
 0x909   : > { %1720 = vmatprep.subr.mxu1 %v1679_v37 }
 0x90a   : > { %1721 = vmatpush1.msra.mxu1 %v1678_v38  ;;  %v1699_v37 = vrot.slane %v1694_v35, %v1698_v34  ;;  %v1703_v38 = vrot.slane %v1694_v35, %v1702_v36 }
 0x90b   : > { %1722 = vmatprep.subr.mxu1 %v1677_v39 }
 0x90c   : > { %1723 = vmatpush1.msra.mxu1 %v1676_v40 }
 0x90d   : > { %1724 = vmatprep.subr.mxu1 %v1675_v41 }
 0x90e   : > { %1725 = vmatpush1.msra.mxu1 %v1674_v42 }
 0x90f   : > { %1726 = vmatprep.subr.mxu1 %v1673_v43 }
 0x910   : > { %1727 = vmatpush1.msra.mxu1 %v1672_v44 }
 0x911   : > { %1728 = vmatprep.subr.mxu1 %v1671_v45 }
 0x912   : > { %1729 = vmatpush1.msra.mxu1 %v1670_v46  ;;  %v2096_v46 = vld [vmem:[%s3454_s12] ss:$0 sm:$0xff] }
 0x913   : > { %1730 = vmatprep.subr.mxu1 %v1669_v47 }
 0x914   : > { %1731 = vmatpush1.msra.mxu1 %v1668_v48 }
 0x915   : > { %1732 = vmatprep.subr.mxu1 %v1667_v49 }
 0x916   : > { %1733 = vmatpush1.msra.mxu1 %v1666_v50 }
 0x917   : > { %1734 = vmatprep.subr.mxu1 %v1665_v51 }
 0x918   : > { %1735 = vmatpush1.msra.mxu1 %v1664_v52 }
 0x919   : > { %1736 = vmatprep.subr.mxu1 %v1663_v53 }
 0x91a   : > { %1737 = vmatpush1.msra.mxu1 %v1662_v54 }
 0x989   : > { %v1637_v26 = vpop.xlane.xlu1 %1636 }
 0x98a   : > { %v1639_v27 = vmul.f32 0.0078125, %v1637_v26  ;;  %v1781_v26 = vld [vmem:[#allocation11 + $0x10] sm:$0xff] }
 0x98b   : > { %2214 = vmatpush3.msra.mxu0 %v1781_v26 }
 0x98c   : > { %v3312_v28 = vsub.f32 %v1633_v19, %v1639_v27  ;;  %v1796_v27 = vld [vmem:[#allocation11 + $0x88] sm:$0xff] }
 0x98d   : > { %2215 = vmatprep.subr.mxu0 %v1796_v27 }
 0x98e   : > { %v1641_v29 = vmul.f32 %v3312_v28, %v3312_v28 }
 0x990   : > { %1642 = vadd.xlane.f32.xlu0 %v1641_v29  ;;  %v1780_v29 = vld [vmem:[#allocation11 + $0x8] sm:$0xff] }
 0x991   : > { %2216 = vmatpush3.msra.mxu0 %v1780_v29 }
 0x992   : > { %2217 = vmatprep.subr.mxu0 %v1795_v30 }
 0xa19   : > { %v1643_v16 = vpop.xlane.xlu0 %1642 }
 0xa1a   : > { %v1644_v17 = vmul.f32 0.0078125, %v1643_v16 }
 0xa1c   : > { %v1645_v18 = vadd.f32 1e-05, %v1644_v17 }
 0xa1e   : > { %2517 = vrsqrt.f32 %v1645_v18 }
 0xa2b   : > { %v2518_v19 = vpop.eup %2517 }
 0xa2c   : > { %v1647_v20 = vmul.f32 %v2518_v19, %v3312_v28  ;;  %v1779_v28 = vld [vmem:[#allocation11] sm:$0xff] }
 0xa2d   : > { %2218 = vmatpush3.msra.mxu0 %v1779_v28 }
 0xa2e   : > { %v1654_v22 = vmul.f32 %v2094_v4, %v1647_v20 }
 0xa30   : > { %v1661_v33 = vadd.f32 %v2095_v21, %v1654_v22 }
 0xa32   : > { %1771 = vmatmul.mubr.f32.vlgmr.msra.gmra.mxu1 %v1661_v33 }
 0xaf2   : > { %v1772_v39 = vpop.f32.mrf.mxu1 }
 0xaf3   : > { %v1773_v40 = vadd.f32 %v1772_v39, %v1699_v37 }
 0xaf4   : > { %v1774_v41 = vpop.f32.mrf.mxu1 }
 0xaf5   : > { %v1775_v42 = vadd.f32 %v1774_v41, %v1703_v38  ;;  %v1777_v44 = vmax.f32 %v1773_v40, 0.0 }
 0xaf7   : > { %v1778_v43 = vmax.f32 %v1775_v42, 0.0 }
 0xaf9   : > { %1882 = vmatprep.mubr.f32.mxu0 %v1778_v43 }
 0xafa   : > { %1883 = vmatmul.mubr.f32.vlgmr.msra.gmra.mxu0 %v1777_v44 }
 0xbba   : > { %v2219_v45 = vpop.f32.mrf.mxu0 }
 0xbbc   : > { %v2220_v47 = vpop.f32.mrf.mxu0 }
 0xbbd   : > { %v2221_v48 = vadd.f32 %v2220_v47, %v2219_v45 }
 0xbbf   : > { %v1885_v49 = vadd.f32 %v2221_v48, %v2096_v46 }
 0xbc1   : > { %v1888_v50 = vadd.f32 %v1885_v49, %v1661_v33 }
 0xbc3   : > { %1891 = vadd.xlane.f32.xlu1 %v1888_v50 }
 0xc4c   : > { %v1892_v51 = vpop.xlane.xlu1 %1891 }
 0xc4d   : > { %v1893_v52 = vmul.f32 0.0078125, %v1892_v51 }
 0xc4f   : > { %v1894_v53 = vsub.f32 %v1888_v50, %v1893_v52 }
 0xc51   : > { %v1895_v54 = vmul.f32 %v1894_v53, %v1894_v53 }
 0xc53   : > { %1896 = vadd.xlane.f32.xlu1 %v1895_v54 }
 0xcdc   : > { %v1897_v55 = vpop.xlane.xlu1 %1896 }
 0xcdd   : > { %v1898_v56 = vmul.f32 0.0078125, %v1897_v55 }
 0xcdf   : > { %v1899_v57 = vadd.f32 1e-05, %v1898_v56 }
 0xce1   : > { %2519 = vrsqrt.f32 %v1899_v57 }
 0xcee   : > { %v2520_v58 = vpop.eup %2519 }
 0xcef   : > { %v1901_v60 = vmul.f32 %v2520_v58, %v1894_v53 }
 0xcf1   : > { %v1908_v62 = vmul.f32 %v2097_v59, %v1901_v60 }
 0xcf3   : > { %v1915_v63 = vadd.f32 %v2098_v61, %v1908_v62 }
 0xcf5   : > { %1916 = vst [vmem:[%s604_s30] sm:$0xff] %v1915_v63 }
 0xcf6   : > { %2694 = shalt.err (!%p2691_p2)
}
 0xcf7   : > { %s2695_s13 = scalar_lea.hbm %s1929_s28, 128  ;;  %s2699_s15 = scalar_lea.hbm %s3501_s27, 512 }
 0xcf8   : > { %p2696_p3 = scmp.ne.s32.totalorder %s1929_s28, %s2695_s13  ;;  %p2700_p7 = scmp.lt.s32.totalorder %s1929_s28, %s3501_s27 }
 0xcf9   : > { %p2701_p9 = scmp.lt.s32.totalorder %s2699_s15, %s2695_s13 }
 0xcfa   : > { %p2697_p0 = pnand %p2696_p3, %p3502_p6 }
 0xcfb   : > { %p2702_p10 = por %p2701_p9, %p2700_p7 }
 0xcfc   : > { %p2698_p13 = pneg %p2697_p0 }
 0xcfe   : > { %p2703_p11 = pnand %p2702_p10, %p2698_p13 }
 0xd00   : > { %2706 = shalt.err (!%p2703_p11)
}
 0xd01   : > { %2422 = dma.vmem_to_hbm [thread:$0]  (%p3502_p6), %s1932_s5, 128, %s1929_s28, %s1918_s25  }
 0xd02 PF: > { %s3503_s22 = sld [smem:[#allocation20_spill]]  ;;  %p2457_p4 = scmp.ge.s32.totalorder %s2761_s21, 2 }
 0xd03   : > { %s3504_s29 = sld [smem:[#allocation24_spill]] }
 0xd08   : > { %s1943_s30 = sand.u32 1, %s3503_s22  }
 0xd09   : > { %p3505_p8 = scmp.ne.s32.totalorder %s3504_s29, 0  ;;  %s1944_s11 = scalar_lea.sflag [#allocation4], %s1943_s30 }
 0xd0b   : > { %p2445_p1 = pnand %p2457_p4, %p3505_p8 }
 0xd0d   : > { %p2446_p5 = pneg %p2445_p1 }
 0xd0f   : > { %2744 = dma.done.wait (%p2446_p5), %s1944_s11, 128  }
 0xd10   : > { %2746 = vsyncadd (%p2446_p5), %s1944_s11, 4294967168  ;;  %s3506_s21 = sld [smem:[#allocation22_spill]]  ;;  %s3509_s18 = smov %s2753_s19 }
 0xd11   : > { %s3507_s26 = sld [smem:[#allocation21_spill]] }
 0xd12   : > { %s3508_s20 = sld [smem:[#allocation23_spill]] }
 0xd16   : > { %p33_p12 = scmp.ge.s32.totalorder %s3506_s21, 6  }
 0xd17   : > { %s3510_s19 = smov %s3507_s26 }
 0xd18   :  { %35 = sbr.rel (!%p33_p12) target bundleno = 17 (0x11), region = 154 }
 0xd1d   :  { %1949 = vsyncpa [#allocation3], 1 }
 0xd1e   :  { %1951 = vsyncpa [#allocation3 + $0x1], 1 }
 0xd1f   :  { %1952 = vsyncpa [#allocation6], 1 }
 0xd20   :  { %1954 = vsyncpa [#allocation6 + $0x1], 1 }
 0xd21   :  { %1955 = vsyncpa [#allocation9], 1 }
 0xd22   :  { %1956 = vsyncpa [#allocation12], 1 }
 0xd23   :  { %1957 = vsyncpa [#allocation4], 1 }
 0xd24   :  { %1959 = vsyncpa [#allocation4 + $0x1], 1 }

</bundles_post_ra>
